<compile_context>
chip_gen: v6e
topology: v6e:2x2x1
jax: 0.10.0
libtpu: 0.0.40
codegen_flags: <defaults>
</compile_context>

<pallas_src>
import jax
import jax.numpy as jnp
from jax.experimental import pallas as pl
from jax.experimental.pallas import tpu as pltpu


def lappe_kernel(vec_ref, val_ref, wA_ref, w1_ref, b1_ref, out_ref, h1_ref):
    # vec_ref/val_ref: (K, TN) f32   -- nodes on the lane axis (TN % 128 == 0)
    # wA_ref: (H1, 3) f32            -- columns [W_A^T[:,0] | W_A^T[:,1] | b_A]
    # w1_ref: (D, H1) bf16           -- W_1^T, pre-cast for the MXU
    # b1_ref: (D, 1) f32
    # out_ref: (D, TN) f32           -- lane-dense output block
    # h1_ref:  (H1, K*TN) bf16 VMEM scratch (hidden-activation slab)
    K, TN = vec_ref.shape
    H1 = wA_ref.shape[0]
    D = out_ref.shape[0]

    # Weights loaded and sliced once, hoisted out of the unrolled K loops.
    wA = wA_ref[...]
    wA0 = wA[:, 0:1]                       # (H1, 1)  EigVecs-channel weights
    wA1 = wA[:, 1:2]                       # (H1, 1)  EigVals-channel weights
    bA = wA[:, 2:3]                        # (H1, 1)
    b1 = b1_ref[...]                       # (D, 1)

    # Stage 1: linear_A on the VPU (f32), per-k streaming; bf16 slab writes.
    for k in range(K):                     # K is small (e.g. 8): static unroll
        vk = vec_ref[k:k + 1, :]           # (1, TN)
        uk = val_ref[k:k + 1, :]           # (1, TN)
        vk0 = jnp.where(jnp.isnan(vk), 0.0, vk)
        uk0 = jnp.where(jnp.isnan(uk), 0.0, uk)
        h1 = jnp.maximum(vk0 * wA0 + uk0 * wA1 + bA, 0.0)         # (H1, TN) f32
        h1_ref[:, pl.ds(k * TN, TN)] = h1.astype(jnp.bfloat16)

    # Stage 2: one long-RHS bf16 MXU matmul with f32 accumulation.
    h2_all = jnp.dot(w1_ref[...], h1_ref[...],
                     preferred_element_type=jnp.float32)           # (D, K*TN)

    # Stage 3: bias + relu + EigVec-NaN mask, segment-sum over the K groups.
    # (mask must be applied BEFORE the K-sum so NaN-padded rows contribute 0.)
    acc = jnp.zeros((D, TN), jnp.float32)
    for k in range(K):
        keep = jnp.logical_not(jnp.isnan(vec_ref[k:k + 1, :]))     # (1, TN)
        h2k = jnp.maximum(h2_all[:, k * TN:(k + 1) * TN] + b1, 0.0)
        acc = acc + jnp.where(keep, h2k, 0.0)
    out_ref[...] = acc


def lappe_forward(eigvecs, eigvals_3d, wA, bA, w1, b1, *, tn=None):
    """eigvecs: [N, K] f32 ; eigvals_3d: [N, K, 1] f32 (PyTorch convention).
    wA: [2, H1], bA: [1, H1], w1: [H1, D], b1: [1, D].
    Returns pe_LapPE: [N, D] f32."""
    eigvals = jnp.squeeze(eigvals_3d, axis=-1)
    N, K = eigvecs.shape
    H1 = wA.shape[1]
    D = w1.shape[1]

    # Node tile: large default to amortize per-grid-step overhead, capped so
    # small graphs still yield >= 2 tiles (v7x has 2 TensorCores per chip).
    if tn is None:
        tn = 4096
    tn = min(tn, 128 * pl.cdiv(N, 2 * 128))
    tn = max(128, (tn // 128) * 128)

    # Pad N up to a multiple of tn with NaN rows: padded rows hit the existing
    # EigVec-NaN mask inside the kernel (contribute exactly 0), sliced off below.
    n_pad = pl.cdiv(N, tn) * tn
    eigvecs = eigvecs.astype(jnp.float32)
    eigvals = eigvals.astype(jnp.float32)
    if n_pad != N:
        pad = jnp.full((n_pad - N, K), jnp.nan, dtype=jnp.float32)
        eigvecs = jnp.concatenate([eigvecs, pad], axis=0)
        eigvals = jnp.concatenate([eigvals, pad], axis=0)

    # Layout plumbing (fuses under jit with the surrounding model):
    vec_t = jnp.transpose(eigvecs)                                  # (K, n_pad)
    val_t = jnp.transpose(eigvals)                                  # (K, n_pad)
    wA_pack = jnp.concatenate(
        [jnp.transpose(wA).astype(jnp.float32),
         jnp.reshape(bA, (H1, 1)).astype(jnp.float32)], axis=1)     # (H1, 3)
    w1_t = jnp.transpose(w1).astype(jnp.bfloat16)                   # (D, H1)
    b1_c = jnp.reshape(b1, (D, 1)).astype(jnp.float32)              # (D, 1)

    out_t = pl.pallas_call(
        lappe_kernel,
        out_shape=jax.ShapeDtypeStruct((D, n_pad), jnp.float32),
        grid_spec=pltpu.PrefetchScalarGridSpec(
            num_scalar_prefetch=0,
            grid=(n_pad // tn,),
            in_specs=[
                pl.BlockSpec((K, tn), lambda i: (0, i)),     # EigVecs tile
                pl.BlockSpec((K, tn), lambda i: (0, i)),     # EigVals tile
                pl.BlockSpec((H1, 3), lambda i: (0, 0)),     # [W_A^T | b_A]
                pl.BlockSpec((D, H1), lambda i: (0, 0)),     # W_1^T (bf16)
                pl.BlockSpec((D, 1), lambda i: (0, 0)),      # b_1
            ],
            out_specs=pl.BlockSpec((D, tn), lambda i: (0, i)),
            scratch_shapes=[pltpu.VMEM((H1, K * tn), jnp.bfloat16)],
        ),
        compiler_params=pltpu.CompilerParams(
            dimension_semantics=("parallel",)),
    )(vec_t, val_t, wA_pack, w1_t, b1_c)

    return jnp.transpose(out_t)[:N]                                 # (N, D)


def lappe_reference(eigvecs, eigvals_3d, wA, bA, w1, b1):
    """Pure-JAX f32 reference mirroring the PyTorch forward (eval mode)."""
    pos_enc = jnp.concatenate([eigvecs[:, :, None], eigvals_3d], axis=2)
    empty_mask = jnp.isnan(pos_enc)
    pos_enc = jnp.where(empty_mask, 0.0, pos_enc)
    h = jnp.maximum(pos_enc @ wA + bA[0], 0.0)
    h = jnp.maximum(h @ w1 + b1[0], 0.0)
    h = jnp.where(empty_mask[:, :, 0:1], 0.0, h)
    return jnp.sum(h, axis=1)


if __name__ == "__main__":
    # Small shapes: N=300 nodes (auto tile -> tn=256, grid=2, exercises NaN
    # padding + multi-tile), K=8 eigen-frequencies, dim_pe=16 (H1=32).
    N, K, dim_pe = 300, 8, 16
    H1 = 2 * dim_pe

    key = jax.random.PRNGKey(0)
    k1, k2, k3, k4, k5, k6, k7 = jax.random.split(key, 7)

    eigvecs = jax.random.normal(k1, (N, K), dtype=jnp.float32)
    eigvals = jax.random.normal(k2, (N, K, 1), dtype=jnp.float32)

    # Mark some frequency slots as "empty" (NaN-padded), as LapPE does.
    pad_mask = jax.random.bernoulli(k3, p=0.25, shape=(N, K))
    eigvecs = jnp.where(pad_mask, jnp.nan, eigvecs)
    eigvals = jnp.where(pad_mask[:, :, None], jnp.nan, eigvals)

    # Deterministic parameter init (PyTorch Linear-style uniform bounds).
    def uniform(k, shape, fan_in):
        bound = 1.0 / jnp.sqrt(jnp.float32(fan_in))
        return jax.random.uniform(k, shape, jnp.float32, -bound, bound)

    wA = uniform(k4, (2, H1), 2)          # linear_A: Linear(2, 2*dim_pe)
    bA = uniform(k5, (1, H1), 2)
    w1 = uniform(k6, (H1, dim_pe), H1)    # pe_encoder Linear(2*dim_pe, dim_pe)
    b1 = uniform(k7, (1, dim_pe), H1)

    fwd = jax.jit(lappe_forward)          # keep layout transposes fused
    pe = jax.block_until_ready(fwd(eigvecs, eigvals, wA, bA, w1, b1))

    ref = lappe_reference(eigvecs, eigvals, wA, bA, w1, b1)
    assert pe.shape == (N, dim_pe)
    # Second Linear runs in bf16 on the MXU (f32 accumulate): loosened tolerance.
    assert jnp.allclose(pe, ref, atol=1e-1, rtol=5e-2), "mismatch vs reference"

    print("KERNEL_OK")
</pallas_src>

<mosaic_0001>
module attributes {stable_mosaic.version = 11 : i64} {
  func.func @lappe_kernel(%arg0: i32, %arg1: memref<8x256xf32, #tpu.memory_space<vmem>>, %arg2: memref<8x256xf32, #tpu.memory_space<vmem>>, %arg3: memref<32x3xf32, #tpu.memory_space<vmem>>, %arg4: memref<16x32xbf16, #tpu.memory_space<vmem>>, %arg5: memref<16x1xf32, #tpu.memory_space<vmem>>, %arg6: memref<16x256xf32, #tpu.memory_space<vmem>>, %arg7: memref<32x2048xbf16, #tpu.memory_space<vmem>>) attributes {dimension_semantics = [#tpu.dimension_semantics<parallel>], iteration_bounds = array<i64: 2>, scalar_prefetch = 0 : i64, scratch_operands = 1 : i64, tpu.core_type = #tpu.core_type<tc>, window_params = [{transform_indices = @transform_0, window_bounds = array<i64: 8, 256>}, {transform_indices = @transform_1, window_bounds = array<i64: 8, 256>}, {pipeline_mode = #tpu.pipeline_mode<synchronous>, transform_indices = @transform_2, window_bounds = array<i64: 32, 3>}, {pipeline_mode = #tpu.pipeline_mode<synchronous>, transform_indices = @transform_3, window_bounds = array<i64: 16, 32>}, {pipeline_mode = #tpu.pipeline_mode<synchronous>, transform_indices = @transform_4, window_bounds = array<i64: 16, 1>}, {transform_indices = @transform_5, window_bounds = array<i64: 16, 256>}]} {
    %c0 = arith.constant 0 : index
    %c0_0 = arith.constant 0 : index
    %0 = vector.load %arg3[%c0, %c0_0] : memref<32x3xf32, #tpu.memory_space<vmem>>, vector<32x3xf32>
    %1 = vector.extract_strided_slice %0 {offsets = [0, 0], sizes = [32, 1], strides = [1, 1]} : vector<32x3xf32> to vector<32x1xf32>
    %2 = vector.extract_strided_slice %0 {offsets = [0, 1], sizes = [32, 1], strides = [1, 1]} : vector<32x3xf32> to vector<32x1xf32>
    %3 = vector.extract_strided_slice %0 {offsets = [0, 2], sizes = [32, 1], strides = [1, 1]} : vector<32x3xf32> to vector<32x1xf32>
    %c0_1 = arith.constant 0 : index
    %c0_2 = arith.constant 0 : index
    %4 = vector.load %arg5[%c0_1, %c0_2] : memref<16x1xf32, #tpu.memory_space<vmem>>, vector<16x1xf32>
    %c0_3 = arith.constant 0 : index
    %c0_4 = arith.constant 0 : index
    %5 = vector.load %arg1[%c0_3, %c0_4] : memref<8x256xf32, #tpu.memory_space<vmem>>, vector<1x256xf32>
    %c0_5 = arith.constant 0 : index
    %c0_6 = arith.constant 0 : index
    %6 = vector.load %arg2[%c0_5, %c0_6] : memref<8x256xf32, #tpu.memory_space<vmem>>, vector<1x256xf32>
    %7 = arith.cmpf one, %5, %5 : vector<1x256xf32>
    %cst = arith.constant 0.000000e+00 : f32
    %8 = vector.broadcast %cst : f32 to vector<1x256xf32>
    %9 = arith.select %7, %8, %5 : vector<1x256xi1>, vector<1x256xf32>
    %10 = arith.cmpf one, %6, %6 : vector<1x256xf32>
    %cst_7 = arith.constant 0.000000e+00 : f32
    %11 = vector.broadcast %cst_7 : f32 to vector<1x256xf32>
    %12 = arith.select %10, %11, %6 : vector<1x256xi1>, vector<1x256xf32>
    %13 = vector.broadcast %9 : vector<1x256xf32> to vector<32x256xf32>
    %14 = vector.broadcast %1 : vector<32x1xf32> to vector<32x256xf32>
    %15 = arith.mulf %13, %14 : vector<32x256xf32>
    %16 = vector.broadcast %12 : vector<1x256xf32> to vector<32x256xf32>
    %17 = vector.broadcast %2 : vector<32x1xf32> to vector<32x256xf32>
    %18 = arith.mulf %16, %17 : vector<32x256xf32>
    %19 = arith.addf %15, %18 : vector<32x256xf32>
    %20 = vector.broadcast %3 : vector<32x1xf32> to vector<32x256xf32>
    %21 = arith.addf %19, %20 : vector<32x256xf32>
    %cst_8 = arith.constant 0.000000e+00 : f32
    %22 = vector.broadcast %cst_8 : f32 to vector<32x256xf32>
    %23 = arith.maximumf %21, %22 : vector<32x256xf32>
    %24 = arith.truncf %23 : vector<32x256xf32> to vector<32x256xbf16>
    %c0_9 = arith.constant 0 : index
    %c0_10 = arith.constant 0 : index
    %25 = vector.load %arg7[%c0_9, %c0_10] : memref<32x2048xbf16, #tpu.memory_space<vmem>>, vector<32x256xbf16>
    tpu.vector_store %arg7[%c0_9, %c0_10], %24 {strides = array<i32>} : memref<32x2048xbf16, #tpu.memory_space<vmem>>, vector<32x256xbf16>,
    %c1 = arith.constant 1 : index
    %c0_11 = arith.constant 0 : index
    %26 = vector.load %arg1[%c1, %c0_11] : memref<8x256xf32, #tpu.memory_space<vmem>>, vector<1x256xf32>
    %c1_12 = arith.constant 1 : index
    %c0_13 = arith.constant 0 : index
    %27 = vector.load %arg2[%c1_12, %c0_13] : memref<8x256xf32, #tpu.memory_space<vmem>>, vector<1x256xf32>
    %28 = arith.cmpf one, %26, %26 : vector<1x256xf32>
    %cst_14 = arith.constant 0.000000e+00 : f32
    %29 = vector.broadcast %cst_14 : f32 to vector<1x256xf32>
    %30 = arith.select %28, %29, %26 : vector<1x256xi1>, vector<1x256xf32>
    %31 = arith.cmpf one, %27, %27 : vector<1x256xf32>
    %cst_15 = arith.constant 0.000000e+00 : f32
    %32 = vector.broadcast %cst_15 : f32 to vector<1x256xf32>
    %33 = arith.select %31, %32, %27 : vector<1x256xi1>, vector<1x256xf32>
    %34 = vector.broadcast %30 : vector<1x256xf32> to vector<32x256xf32>
    %35 = vector.broadcast %1 : vector<32x1xf32> to vector<32x256xf32>
    %36 = arith.mulf %34, %35 : vector<32x256xf32>
    %37 = vector.broadcast %33 : vector<1x256xf32> to vector<32x256xf32>
    %38 = vector.broadcast %2 : vector<32x1xf32> to vector<32x256xf32>
    %39 = arith.mulf %37, %38 : vector<32x256xf32>
    %40 = arith.addf %36, %39 : vector<32x256xf32>
    %41 = vector.broadcast %3 : vector<32x1xf32> to vector<32x256xf32>
    %42 = arith.addf %40, %41 : vector<32x256xf32>
    %cst_16 = arith.constant 0.000000e+00 : f32
    %43 = vector.broadcast %cst_16 : f32 to vector<32x256xf32>
    %44 = arith.maximumf %42, %43 : vector<32x256xf32>
    %45 = arith.truncf %44 : vector<32x256xf32> to vector<32x256xbf16>
    %c0_17 = arith.constant 0 : index
    %c256 = arith.constant 256 : index
    %46 = vector.load %arg7[%c0_17, %c256] : memref<32x2048xbf16, #tpu.memory_space<vmem>>, vector<32x256xbf16>
    tpu.vector_store %arg7[%c0_17, %c256], %45 {strides = array<i32>} : memref<32x2048xbf16, #tpu.memory_space<vmem>>, vector<32x256xbf16>,
    %c2 = arith.constant 2 : index
    %c0_18 = arith.constant 0 : index
    %47 = vector.load %arg1[%c2, %c0_18] : memref<8x256xf32, #tpu.memory_space<vmem>>, vector<1x256xf32>
    %c2_19 = arith.constant 2 : index
    %c0_20 = arith.constant 0 : index
    %48 = vector.load %arg2[%c2_19, %c0_20] : memref<8x256xf32, #tpu.memory_space<vmem>>, vector<1x256xf32>
    %49 = arith.cmpf one, %47, %47 : vector<1x256xf32>
    %cst_21 = arith.constant 0.000000e+00 : f32
    %50 = vector.broadcast %cst_21 : f32 to vector<1x256xf32>
    %51 = arith.select %49, %50, %47 : vector<1x256xi1>, vector<1x256xf32>
    %52 = arith.cmpf one, %48, %48 : vector<1x256xf32>
    %cst_22 = arith.constant 0.000000e+00 : f32
    %53 = vector.broadcast %cst_22 : f32 to vector<1x256xf32>
    %54 = arith.select %52, %53, %48 : vector<1x256xi1>, vector<1x256xf32>
    %55 = vector.broadcast %51 : vector<1x256xf32> to vector<32x256xf32>
    %56 = vector.broadcast %1 : vector<32x1xf32> to vector<32x256xf32>
    %57 = arith.mulf %55, %56 : vector<32x256xf32>
    %58 = vector.broadcast %54 : vector<1x256xf32> to vector<32x256xf32>
    %59 = vector.broadcast %2 : vector<32x1xf32> to vector<32x256xf32>
    %60 = arith.mulf %58, %59 : vector<32x256xf32>
    %61 = arith.addf %57, %60 : vector<32x256xf32>
    %62 = vector.broadcast %3 : vector<32x1xf32> to vector<32x256xf32>
    %63 = arith.addf %61, %62 : vector<32x256xf32>
    %cst_23 = arith.constant 0.000000e+00 : f32
    %64 = vector.broadcast %cst_23 : f32 to vector<32x256xf32>
    %65 = arith.maximumf %63, %64 : vector<32x256xf32>
    %66 = arith.truncf %65 : vector<32x256xf32> to vector<32x256xbf16>
    %c0_24 = arith.constant 0 : index
    %c512 = arith.constant 512 : index
    %67 = vector.load %arg7[%c0_24, %c512] : memref<32x2048xbf16, #tpu.memory_space<vmem>>, vector<32x256xbf16>
    tpu.vector_store %arg7[%c0_24, %c512], %66 {strides = array<i32>} : memref<32x2048xbf16, #tpu.memory_space<vmem>>, vector<32x256xbf16>,
    %c3 = arith.constant 3 : index
    %c0_25 = arith.constant 0 : index
    %68 = vector.load %arg1[%c3, %c0_25] : memref<8x256xf32, #tpu.memory_space<vmem>>, vector<1x256xf32>
    %c3_26 = arith.constant 3 : index
    %c0_27 = arith.constant 0 : index
    %69 = vector.load %arg2[%c3_26, %c0_27] : memref<8x256xf32, #tpu.memory_space<vmem>>, vector<1x256xf32>
    %70 = arith.cmpf one, %68, %68 : vector<1x256xf32>
    %cst_28 = arith.constant 0.000000e+00 : f32
    %71 = vector.broadcast %cst_28 : f32 to vector<1x256xf32>
    %72 = arith.select %70, %71, %68 : vector<1x256xi1>, vector<1x256xf32>
    %73 = arith.cmpf one, %69, %69 : vector<1x256xf32>
    %cst_29 = arith.constant 0.000000e+00 : f32
    %74 = vector.broadcast %cst_29 : f32 to vector<1x256xf32>
    %75 = arith.select %73, %74, %69 : vector<1x256xi1>, vector<1x256xf32>
    %76 = vector.broadcast %72 : vector<1x256xf32> to vector<32x256xf32>
    %77 = vector.broadcast %1 : vector<32x1xf32> to vector<32x256xf32>
    %78 = arith.mulf %76, %77 : vector<32x256xf32>
    %79 = vector.broadcast %75 : vector<1x256xf32> to vector<32x256xf32>
    %80 = vector.broadcast %2 : vector<32x1xf32> to vector<32x256xf32>
    %81 = arith.mulf %79, %80 : vector<32x256xf32>
    %82 = arith.addf %78, %81 : vector<32x256xf32>
    %83 = vector.broadcast %3 : vector<32x1xf32> to vector<32x256xf32>
    %84 = arith.addf %82, %83 : vector<32x256xf32>
    %cst_30 = arith.constant 0.000000e+00 : f32
    %85 = vector.broadcast %cst_30 : f32 to vector<32x256xf32>
    %86 = arith.maximumf %84, %85 : vector<32x256xf32>
    %87 = arith.truncf %86 : vector<32x256xf32> to vector<32x256xbf16>
    %c0_31 = arith.constant 0 : index
    %c768 = arith.constant 768 : index
    %88 = vector.load %arg7[%c0_31, %c768] : memref<32x2048xbf16, #tpu.memory_space<vmem>>, vector<32x256xbf16>
    tpu.vector_store %arg7[%c0_31, %c768], %87 {strides = array<i32>} : memref<32x2048xbf16, #tpu.memory_space<vmem>>, vector<32x256xbf16>,
    %c4 = arith.constant 4 : index
    %c0_32 = arith.constant 0 : index
    %89 = vector.load %arg1[%c4, %c0_32] : memref<8x256xf32, #tpu.memory_space<vmem>>, vector<1x256xf32>
    %c4_33 = arith.constant 4 : index
    %c0_34 = arith.constant 0 : index
    %90 = vector.load %arg2[%c4_33, %c0_34] : memref<8x256xf32, #tpu.memory_space<vmem>>, vector<1x256xf32>
    %91 = arith.cmpf one, %89, %89 : vector<1x256xf32>
    %cst_35 = arith.constant 0.000000e+00 : f32
    %92 = vector.broadcast %cst_35 : f32 to vector<1x256xf32>
    %93 = arith.select %91, %92, %89 : vector<1x256xi1>, vector<1x256xf32>
    %94 = arith.cmpf one, %90, %90 : vector<1x256xf32>
    %cst_36 = arith.constant 0.000000e+00 : f32
    %95 = vector.broadcast %cst_36 : f32 to vector<1x256xf32>
    %96 = arith.select %94, %95, %90 : vector<1x256xi1>, vector<1x256xf32>
    %97 = vector.broadcast %93 : vector<1x256xf32> to vector<32x256xf32>
    %98 = vector.broadcast %1 : vector<32x1xf32> to vector<32x256xf32>
    %99 = arith.mulf %97, %98 : vector<32x256xf32>
    %100 = vector.broadcast %96 : vector<1x256xf32> to vector<32x256xf32>
    %101 = vector.broadcast %2 : vector<32x1xf32> to vector<32x256xf32>
    %102 = arith.mulf %100, %101 : vector<32x256xf32>
    %103 = arith.addf %99, %102 : vector<32x256xf32>
    %104 = vector.broadcast %3 : vector<32x1xf32> to vector<32x256xf32>
    %105 = arith.addf %103, %104 : vector<32x256xf32>
    %cst_37 = arith.constant 0.000000e+00 : f32
    %106 = vector.broadcast %cst_37 : f32 to vector<32x256xf32>
    %107 = arith.maximumf %105, %106 : vector<32x256xf32>
    %108 = arith.truncf %107 : vector<32x256xf32> to vector<32x256xbf16>
    %c0_38 = arith.constant 0 : index
    %c1024 = arith.constant 1024 : index
    %109 = vector.load %arg7[%c0_38, %c1024] : memref<32x2048xbf16, #tpu.memory_space<vmem>>, vector<32x256xbf16>
    tpu.vector_store %arg7[%c0_38, %c1024], %108 {strides = array<i32>} : memref<32x2048xbf16, #tpu.memory_space<vmem>>, vector<32x256xbf16>,
    %c5 = arith.constant 5 : index
    %c0_39 = arith.constant 0 : index
    %110 = vector.load %arg1[%c5, %c0_39] : memref<8x256xf32, #tpu.memory_space<vmem>>, vector<1x256xf32>
    %c5_40 = arith.constant 5 : index
    %c0_41 = arith.constant 0 : index
    %111 = vector.load %arg2[%c5_40, %c0_41] : memref<8x256xf32, #tpu.memory_space<vmem>>, vector<1x256xf32>
    %112 = arith.cmpf one, %110, %110 : vector<1x256xf32>
    %cst_42 = arith.constant 0.000000e+00 : f32
    %113 = vector.broadcast %cst_42 : f32 to vector<1x256xf32>
    %114 = arith.select %112, %113, %110 : vector<1x256xi1>, vector<1x256xf32>
    %115 = arith.cmpf one, %111, %111 : vector<1x256xf32>
    %cst_43 = arith.constant 0.000000e+00 : f32
    %116 = vector.broadcast %cst_43 : f32 to vector<1x256xf32>
    %117 = arith.select %115, %116, %111 : vector<1x256xi1>, vector<1x256xf32>
    %118 = vector.broadcast %114 : vector<1x256xf32> to vector<32x256xf32>
    %119 = vector.broadcast %1 : vector<32x1xf32> to vector<32x256xf32>
    %120 = arith.mulf %118, %119 : vector<32x256xf32>
    %121 = vector.broadcast %117 : vector<1x256xf32> to vector<32x256xf32>
    %122 = vector.broadcast %2 : vector<32x1xf32> to vector<32x256xf32>
    %123 = arith.mulf %121, %122 : vector<32x256xf32>
    %124 = arith.addf %120, %123 : vector<32x256xf32>
    %125 = vector.broadcast %3 : vector<32x1xf32> to vector<32x256xf32>
    %126 = arith.addf %124, %125 : vector<32x256xf32>
    %cst_44 = arith.constant 0.000000e+00 : f32
    %127 = vector.broadcast %cst_44 : f32 to vector<32x256xf32>
    %128 = arith.maximumf %126, %127 : vector<32x256xf32>
    %129 = arith.truncf %128 : vector<32x256xf32> to vector<32x256xbf16>
    %c0_45 = arith.constant 0 : index
    %c1280 = arith.constant 1280 : index
    %130 = vector.load %arg7[%c0_45, %c1280] : memref<32x2048xbf16, #tpu.memory_space<vmem>>, vector<32x256xbf16>
    tpu.vector_store %arg7[%c0_45, %c1280], %129 {strides = array<i32>} : memref<32x2048xbf16, #tpu.memory_space<vmem>>, vector<32x256xbf16>,
    %c6 = arith.constant 6 : index
    %c0_46 = arith.constant 0 : index
    %131 = vector.load %arg1[%c6, %c0_46] : memref<8x256xf32, #tpu.memory_space<vmem>>, vector<1x256xf32>
    %c6_47 = arith.constant 6 : index
    %c0_48 = arith.constant 0 : index
    %132 = vector.load %arg2[%c6_47, %c0_48] : memref<8x256xf32, #tpu.memory_space<vmem>>, vector<1x256xf32>
    %133 = arith.cmpf one, %131, %131 : vector<1x256xf32>
    %cst_49 = arith.constant 0.000000e+00 : f32
    %134 = vector.broadcast %cst_49 : f32 to vector<1x256xf32>
    %135 = arith.select %133, %134, %131 : vector<1x256xi1>, vector<1x256xf32>
    %136 = arith.cmpf one, %132, %132 : vector<1x256xf32>
    %cst_50 = arith.constant 0.000000e+00 : f32
    %137 = vector.broadcast %cst_50 : f32 to vector<1x256xf32>
    %138 = arith.select %136, %137, %132 : vector<1x256xi1>, vector<1x256xf32>
    %139 = vector.broadcast %135 : vector<1x256xf32> to vector<32x256xf32>
    %140 = vector.broadcast %1 : vector<32x1xf32> to vector<32x256xf32>
    %141 = arith.mulf %139, %140 : vector<32x256xf32>
    %142 = vector.broadcast %138 : vector<1x256xf32> to vector<32x256xf32>
    %143 = vector.broadcast %2 : vector<32x1xf32> to vector<32x256xf32>
    %144 = arith.mulf %142, %143 : vector<32x256xf32>
    %145 = arith.addf %141, %144 : vector<32x256xf32>
    %146 = vector.broadcast %3 : vector<32x1xf32> to vector<32x256xf32>
    %147 = arith.addf %145, %146 : vector<32x256xf32>
    %cst_51 = arith.constant 0.000000e+00 : f32
    %148 = vector.broadcast %cst_51 : f32 to vector<32x256xf32>
    %149 = arith.maximumf %147, %148 : vector<32x256xf32>
    %150 = arith.truncf %149 : vector<32x256xf32> to vector<32x256xbf16>
    %c0_52 = arith.constant 0 : index
    %c1536 = arith.constant 1536 : index
    %151 = vector.load %arg7[%c0_52, %c1536] : memref<32x2048xbf16, #tpu.memory_space<vmem>>, vector<32x256xbf16>
    tpu.vector_store %arg7[%c0_52, %c1536], %150 {strides = array<i32>} : memref<32x2048xbf16, #tpu.memory_space<vmem>>, vector<32x256xbf16>,
    %c7 = arith.constant 7 : index
    %c0_53 = arith.constant 0 : index
    %152 = vector.load %arg1[%c7, %c0_53] : memref<8x256xf32, #tpu.memory_space<vmem>>, vector<1x256xf32>
    %c7_54 = arith.constant 7 : index
    %c0_55 = arith.constant 0 : index
    %153 = vector.load %arg2[%c7_54, %c0_55] : memref<8x256xf32, #tpu.memory_space<vmem>>, vector<1x256xf32>
    %154 = arith.cmpf one, %152, %152 : vector<1x256xf32>
    %cst_56 = arith.constant 0.000000e+00 : f32
    %155 = vector.broadcast %cst_56 : f32 to vector<1x256xf32>
    %156 = arith.select %154, %155, %152 : vector<1x256xi1>, vector<1x256xf32>
    %157 = arith.cmpf one, %153, %153 : vector<1x256xf32>
    %cst_57 = arith.constant 0.000000e+00 : f32
    %158 = vector.broadcast %cst_57 : f32 to vector<1x256xf32>
    %159 = arith.select %157, %158, %153 : vector<1x256xi1>, vector<1x256xf32>
    %160 = vector.broadcast %156 : vector<1x256xf32> to vector<32x256xf32>
    %161 = vector.broadcast %1 : vector<32x1xf32> to vector<32x256xf32>
    %162 = arith.mulf %160, %161 : vector<32x256xf32>
    %163 = vector.broadcast %159 : vector<1x256xf32> to vector<32x256xf32>
    %164 = vector.broadcast %2 : vector<32x1xf32> to vector<32x256xf32>
    %165 = arith.mulf %163, %164 : vector<32x256xf32>
    %166 = arith.addf %162, %165 : vector<32x256xf32>
    %167 = vector.broadcast %3 : vector<32x1xf32> to vector<32x256xf32>
    %168 = arith.addf %166, %167 : vector<32x256xf32>
    %cst_58 = arith.constant 0.000000e+00 : f32
    %169 = vector.broadcast %cst_58 : f32 to vector<32x256xf32>
    %170 = arith.maximumf %168, %169 : vector<32x256xf32>
    %171 = arith.truncf %170 : vector<32x256xf32> to vector<32x256xbf16>
    %c0_59 = arith.constant 0 : index
    %c1792 = arith.constant 1792 : index
    %172 = vector.load %arg7[%c0_59, %c1792] : memref<32x2048xbf16, #tpu.memory_space<vmem>>, vector<32x256xbf16>
    tpu.vector_store %arg7[%c0_59, %c1792], %171 {strides = array<i32>} : memref<32x2048xbf16, #tpu.memory_space<vmem>>, vector<32x256xbf16>,
    %c0_60 = arith.constant 0 : index
    %c0_61 = arith.constant 0 : index
    %173 = vector.load %arg4[%c0_60, %c0_61] : memref<16x32xbf16, #tpu.memory_space<vmem>>, vector<16x32xbf16>
    %c0_62 = arith.constant 0 : index
    %c0_63 = arith.constant 0 : index
    %174 = vector.load %arg7[%c0_62, %c0_63] : memref<32x2048xbf16, #tpu.memory_space<vmem>>, vector<32x2048xbf16>
    %cst_64 = arith.constant dense<0.000000e+00> : vector<16x2048xf32>
    %175 = tpu.matmul %173, %174, %cst_64 {dimension_numbers = #tpu.dot_dimension_numbers<[1], [0], [0], [1], [0, 0, 1, 1], [], []>} : vector<16x32xbf16>, vector<32x2048xbf16>, vector<16x2048xf32> -> vector<16x2048xf32>
    %cst_65 = arith.constant 0.000000e+00 : f32
    %176 = vector.broadcast %cst_65 : f32 to vector<16x256xf32>
    %c0_66 = arith.constant 0 : index
    %c0_67 = arith.constant 0 : index
    %177 = vector.load %arg1[%c0_66, %c0_67] : memref<8x256xf32, #tpu.memory_space<vmem>>, vector<1x256xf32>
    %178 = arith.cmpf one, %177, %177 : vector<1x256xf32>
    %cst_68 = arith.constant dense<true> : vector<1x256xi1>
    %179 = arith.xori %178, %cst_68 : vector<1x256xi1>
    %180 = vector.extract_strided_slice %175 {offsets = [0, 0], sizes = [16, 256], strides = [1, 1]} : vector<16x2048xf32> to vector<16x256xf32>
    %181 = vector.broadcast %4 : vector<16x1xf32> to vector<16x256xf32>
    %182 = arith.addf %180, %181 : vector<16x256xf32>
    %cst_69 = arith.constant 0.000000e+00 : f32
    %183 = vector.broadcast %cst_69 : f32 to vector<16x256xf32>
    %184 = arith.maximumf %182, %183 : vector<16x256xf32>
    %cst_70 = arith.constant 0.000000e+00 : f32
    %185 = vector.shape_cast %179 : vector<1x256xi1> to vector<1x256xi1>
    %186 = vector.broadcast %185 : vector<1x256xi1> to vector<16x256xi1>
    %187 = vector.broadcast %cst_70 : f32 to vector<16x256xf32>
    %188 = arith.select %186, %184, %187 : vector<16x256xi1>, vector<16x256xf32>
    %189 = arith.addf %176, %188 : vector<16x256xf32>
    %c1_71 = arith.constant 1 : index
    %c0_72 = arith.constant 0 : index
    %190 = vector.load %arg1[%c1_71, %c0_72] : memref<8x256xf32, #tpu.memory_space<vmem>>, vector<1x256xf32>
    %191 = arith.cmpf one, %190, %190 : vector<1x256xf32>
    %cst_73 = arith.constant dense<true> : vector<1x256xi1>
    %192 = arith.xori %191, %cst_73 : vector<1x256xi1>
    %193 = vector.extract_strided_slice %175 {offsets = [0, 256], sizes = [16, 256], strides = [1, 1]} : vector<16x2048xf32> to vector<16x256xf32>
    %194 = vector.broadcast %4 : vector<16x1xf32> to vector<16x256xf32>
    %195 = arith.addf %193, %194 : vector<16x256xf32>
    %cst_74 = arith.constant 0.000000e+00 : f32
    %196 = vector.broadcast %cst_74 : f32 to vector<16x256xf32>
    %197 = arith.maximumf %195, %196 : vector<16x256xf32>
    %cst_75 = arith.constant 0.000000e+00 : f32
    %198 = vector.shape_cast %192 : vector<1x256xi1> to vector<1x256xi1>
    %199 = vector.broadcast %198 : vector<1x256xi1> to vector<16x256xi1>
    %200 = vector.broadcast %cst_75 : f32 to vector<16x256xf32>
    %201 = arith.select %199, %197, %200 : vector<16x256xi1>, vector<16x256xf32>
    %202 = arith.addf %189, %201 : vector<16x256xf32>
    %c2_76 = arith.constant 2 : index
    %c0_77 = arith.constant 0 : index
    %203 = vector.load %arg1[%c2_76, %c0_77] : memref<8x256xf32, #tpu.memory_space<vmem>>, vector<1x256xf32>
    %204 = arith.cmpf one, %203, %203 : vector<1x256xf32>
    %cst_78 = arith.constant dense<true> : vector<1x256xi1>
    %205 = arith.xori %204, %cst_78 : vector<1x256xi1>
    %206 = vector.extract_strided_slice %175 {offsets = [0, 512], sizes = [16, 256], strides = [1, 1]} : vector<16x2048xf32> to vector<16x256xf32>
    %207 = vector.broadcast %4 : vector<16x1xf32> to vector<16x256xf32>
    %208 = arith.addf %206, %207 : vector<16x256xf32>
    %cst_79 = arith.constant 0.000000e+00 : f32
    %209 = vector.broadcast %cst_79 : f32 to vector<16x256xf32>
    %210 = arith.maximumf %208, %209 : vector<16x256xf32>
    %cst_80 = arith.constant 0.000000e+00 : f32
    %211 = vector.shape_cast %205 : vector<1x256xi1> to vector<1x256xi1>
    %212 = vector.broadcast %211 : vector<1x256xi1> to vector<16x256xi1>
    %213 = vector.broadcast %cst_80 : f32 to vector<16x256xf32>
    %214 = arith.select %212, %210, %213 : vector<16x256xi1>, vector<16x256xf32>
    %215 = arith.addf %202, %214 : vector<16x256xf32>
    %c3_81 = arith.constant 3 : index
    %c0_82 = arith.constant 0 : index
    %216 = vector.load %arg1[%c3_81, %c0_82] : memref<8x256xf32, #tpu.memory_space<vmem>>, vector<1x256xf32>
    %217 = arith.cmpf one, %216, %216 : vector<1x256xf32>
    %cst_83 = arith.constant dense<true> : vector<1x256xi1>
    %218 = arith.xori %217, %cst_83 : vector<1x256xi1>
    %219 = vector.extract_strided_slice %175 {offsets = [0, 768], sizes = [16, 256], strides = [1, 1]} : vector<16x2048xf32> to vector<16x256xf32>
    %220 = vector.broadcast %4 : vector<16x1xf32> to vector<16x256xf32>
    %221 = arith.addf %219, %220 : vector<16x256xf32>
    %cst_84 = arith.constant 0.000000e+00 : f32
    %222 = vector.broadcast %cst_84 : f32 to vector<16x256xf32>
    %223 = arith.maximumf %221, %222 : vector<16x256xf32>
    %cst_85 = arith.constant 0.000000e+00 : f32
    %224 = vector.shape_cast %218 : vector<1x256xi1> to vector<1x256xi1>
    %225 = vector.broadcast %224 : vector<1x256xi1> to vector<16x256xi1>
    %226 = vector.broadcast %cst_85 : f32 to vector<16x256xf32>
    %227 = arith.select %225, %223, %226 : vector<16x256xi1>, vector<16x256xf32>
    %228 = arith.addf %215, %227 : vector<16x256xf32>
    %c4_86 = arith.constant 4 : index
    %c0_87 = arith.constant 0 : index
    %229 = vector.load %arg1[%c4_86, %c0_87] : memref<8x256xf32, #tpu.memory_space<vmem>>, vector<1x256xf32>
    %230 = arith.cmpf one, %229, %229 : vector<1x256xf32>
    %cst_88 = arith.constant dense<true> : vector<1x256xi1>
    %231 = arith.xori %230, %cst_88 : vector<1x256xi1>
    %232 = vector.extract_strided_slice %175 {offsets = [0, 1024], sizes = [16, 256], strides = [1, 1]} : vector<16x2048xf32> to vector<16x256xf32>
    %233 = vector.broadcast %4 : vector<16x1xf32> to vector<16x256xf32>
    %234 = arith.addf %232, %233 : vector<16x256xf32>
    %cst_89 = arith.constant 0.000000e+00 : f32
    %235 = vector.broadcast %cst_89 : f32 to vector<16x256xf32>
    %236 = arith.maximumf %234, %235 : vector<16x256xf32>
    %cst_90 = arith.constant 0.000000e+00 : f32
    %237 = vector.shape_cast %231 : vector<1x256xi1> to vector<1x256xi1>
    %238 = vector.broadcast %237 : vector<1x256xi1> to vector<16x256xi1>
    %239 = vector.broadcast %cst_90 : f32 to vector<16x256xf32>
    %240 = arith.select %238, %236, %239 : vector<16x256xi1>, vector<16x256xf32>
    %241 = arith.addf %228, %240 : vector<16x256xf32>
    %c5_91 = arith.constant 5 : index
    %c0_92 = arith.constant 0 : index
    %242 = vector.load %arg1[%c5_91, %c0_92] : memref<8x256xf32, #tpu.memory_space<vmem>>, vector<1x256xf32>
    %243 = arith.cmpf one, %242, %242 : vector<1x256xf32>
    %cst_93 = arith.constant dense<true> : vector<1x256xi1>
    %244 = arith.xori %243, %cst_93 : vector<1x256xi1>
    %245 = vector.extract_strided_slice %175 {offsets = [0, 1280], sizes = [16, 256], strides = [1, 1]} : vector<16x2048xf32> to vector<16x256xf32>
    %246 = vector.broadcast %4 : vector<16x1xf32> to vector<16x256xf32>
    %247 = arith.addf %245, %246 : vector<16x256xf32>
    %cst_94 = arith.constant 0.000000e+00 : f32
    %248 = vector.broadcast %cst_94 : f32 to vector<16x256xf32>
    %249 = arith.maximumf %247, %248 : vector<16x256xf32>
    %cst_95 = arith.constant 0.000000e+00 : f32
    %250 = vector.shape_cast %244 : vector<1x256xi1> to vector<1x256xi1>
    %251 = vector.broadcast %250 : vector<1x256xi1> to vector<16x256xi1>
    %252 = vector.broadcast %cst_95 : f32 to vector<16x256xf32>
    %253 = arith.select %251, %249, %252 : vector<16x256xi1>, vector<16x256xf32>
    %254 = arith.addf %241, %253 : vector<16x256xf32>
    %c6_96 = arith.constant 6 : index
    %c0_97 = arith.constant 0 : index
    %255 = vector.load %arg1[%c6_96, %c0_97] : memref<8x256xf32, #tpu.memory_space<vmem>>, vector<1x256xf32>
    %256 = arith.cmpf one, %255, %255 : vector<1x256xf32>
    %cst_98 = arith.constant dense<true> : vector<1x256xi1>
    %257 = arith.xori %256, %cst_98 : vector<1x256xi1>
    %258 = vector.extract_strided_slice %175 {offsets = [0, 1536], sizes = [16, 256], strides = [1, 1]} : vector<16x2048xf32> to vector<16x256xf32>
    %259 = vector.broadcast %4 : vector<16x1xf32> to vector<16x256xf32>
    %260 = arith.addf %258, %259 : vector<16x256xf32>
    %cst_99 = arith.constant 0.000000e+00 : f32
    %261 = vector.broadcast %cst_99 : f32 to vector<16x256xf32>
    %262 = arith.maximumf %260, %261 : vector<16x256xf32>
    %cst_100 = arith.constant 0.000000e+00 : f32
    %263 = vector.shape_cast %257 : vector<1x256xi1> to vector<1x256xi1>
    %264 = vector.broadcast %263 : vector<1x256xi1> to vector<16x256xi1>
    %265 = vector.broadcast %cst_100 : f32 to vector<16x256xf32>
    %266 = arith.select %264, %262, %265 : vector<16x256xi1>, vector<16x256xf32>
    %267 = arith.addf %254, %266 : vector<16x256xf32>
    %c7_101 = arith.constant 7 : index
    %c0_102 = arith.constant 0 : index
    %268 = vector.load %arg1[%c7_101, %c0_102] : memref<8x256xf32, #tpu.memory_space<vmem>>, vector<1x256xf32>
    %269 = arith.cmpf one, %268, %268 : vector<1x256xf32>
    %cst_103 = arith.constant dense<true> : vector<1x256xi1>
    %270 = arith.xori %269, %cst_103 : vector<1x256xi1>
    %271 = vector.extract_strided_slice %175 {offsets = [0, 1792], sizes = [16, 256], strides = [1, 1]} : vector<16x2048xf32> to vector<16x256xf32>
    %272 = vector.broadcast %4 : vector<16x1xf32> to vector<16x256xf32>
    %273 = arith.addf %271, %272 : vector<16x256xf32>
    %cst_104 = arith.constant 0.000000e+00 : f32
    %274 = vector.broadcast %cst_104 : f32 to vector<16x256xf32>
    %275 = arith.maximumf %273, %274 : vector<16x256xf32>
    %cst_105 = arith.constant 0.000000e+00 : f32
    %276 = vector.shape_cast %270 : vector<1x256xi1> to vector<1x256xi1>
    %277 = vector.broadcast %276 : vector<1x256xi1> to vector<16x256xi1>
    %278 = vector.broadcast %cst_105 : f32 to vector<16x256xf32>
    %279 = arith.select %277, %275, %278 : vector<16x256xi1>, vector<16x256xf32>
    %280 = arith.addf %267, %279 : vector<16x256xf32>
    %c0_106 = arith.constant 0 : index
    %c0_107 = arith.constant 0 : index
    %281 = vector.load %arg6[%c0_106, %c0_107] : memref<16x256xf32, #tpu.memory_space<vmem>>, vector<16x256xf32>
    tpu.vector_store %arg6[%c0_106, %c0_107], %280 {strides = array<i32>} : memref<16x256xf32, #tpu.memory_space<vmem>>, vector<16x256xf32>,
    return
  }
  func.func @transform_0(%arg0: i32) -> (i32, i32) {
    %c0_i32 = arith.constant 0 : i32
    %c0_i32_0 = arith.constant 0 : i32
    return %c0_i32, %arg0 : i32, i32
  }
  func.func @transform_1(%arg0: i32) -> (i32, i32) {
    %c0_i32 = arith.constant 0 : i32
    %c0_i32_0 = arith.constant 0 : i32
    return %c0_i32, %arg0 : i32, i32
  }
  func.func @transform_2(%arg0: i32) -> (i32, i32) {
    %c0_i32 = arith.constant 0 : i32
    %c0_i32_0 = arith.constant 0 : i32
    %c0_i32_1 = arith.constant 0 : i32
    return %c0_i32, %c0_i32_0 : i32, i32
  }
  func.func @transform_3(%arg0: i32) -> (i32, i32) {
    %c0_i32 = arith.constant 0 : i32
    %c0_i32_0 = arith.constant 0 : i32
    %c0_i32_1 = arith.constant 0 : i32
    return %c0_i32, %c0_i32_0 : i32, i32
  }
  func.func @transform_4(%arg0: i32) -> (i32, i32) {
    %c0_i32 = arith.constant 0 : i32
    %c0_i32_0 = arith.constant 0 : i32
    %c0_i32_1 = arith.constant 0 : i32
    return %c0_i32, %c0_i32_0 : i32, i32
  }
  func.func @transform_5(%arg0: i32) -> (i32, i32) {
    %c0_i32 = arith.constant 0 : i32
    %c0_i32_0 = arith.constant 0 : i32
    return %c0_i32, %arg0 : i32, i32
  }
}

</mosaic_0001>

<bundles_post_ra>
// kernel: lappe_forward.1
= control target key start
LH: loop header
LB: loop body
LE: loop exit
PB: predicated region body
PF: predicated region fallthrough
CT: control target
= control target key end

     0   :  { %s2251_s18 = smov 0   ;;  %s2253_s19 = smov 0   ;;  %s3080_s0 = inlined_call_operand.vmem [shape: f32[8,512], index: 0, kind: input, shape index: {}]   ;;  %s3081_s1 = inlined_call_operand.vmem [shape: f32[8,512], index: 1, kind: input, shape index: {}]   ;;  %s3082_s2 = inlined_call_operand.vmem [shape: f32[32,3], index: 2, kind: input, shape index: {}]   ;;  %s3083_s3 = inlined_call_operand.vmem [shape: bf16[16,32], index: 3, kind: input, shape index: {}]   ;;  %s3084_s4 = inlined_call_operand.vmem [shape: f32[16,1], index: 4, kind: input, shape index: {}]   ;;  %s3085_s5 = inlined_call_operand.vmem [shape: f32[16,512], index: 5, kind: output, shape index: {}]  }
   0x1   :  { %s2255_s20 = smov 0  }
   0x2 LB: > { %s2264_s21 = sadd.s32 4294967295, %s2215_s20   ;;  %s2266_s22 = sadd.s32 1, %s2215_s20   ;;  %s2215_s20 = sphi %s2255_s20, %s3196_s20   ;;  %s2211_s19 = sphi %s2253_s19, %s3195_s19   ;;  %s2207_s18 = sphi %s2251_s18, %s3194_s18  }
   0x3   : > { %s134_s23 = ssub.s32 %s2215_s20, %s2266_s22  ;;  %s137_s24 = sadd.s32 1, %s2211_s19 }
   0x4   : > { %p135_p0 = scmp.eq.s32.totalorder %s134_s23, 0  ;;  %p147_p1 = scmp.ne.s32.totalorder %s2211_s19, %s2207_s18 }
   0x5   : > { %p148_p2 = scmp.eq.s32.totalorder %s2264_s21, 1  ;;  %p1985_p3 = scmp.ge.s32.totalorder %s2215_s20, 1 }
   0x6   : > { %s2274_s25 = scalar_select %p135_p0, %s2211_s19, %s137_s24  }
   0x7   : > { %p2276_p4 = por %p148_p2, %p147_p1  ;;  %p199_p5 = scmp.lt.s32.totalorder %s2215_s20, 3 }
   0x9   : > { %p200_p6 = pnand %p1985_p3, %p199_p5 }
   0xb   : > { %203 = sbr.rel (%p200_p6) target bundleno = 456 (0x1c8), region = 40 }
  0x10   : > { %v247_v0 = vld [vmem:[%s3082_s2 + $0x10] sm:$0xff]  ;;  %v2217_v1 = vmov 1   ;;  %v3086_v2 = vmov 0   ;;  %v248_v3 = vld [vmem:[%s3082_s2 + $0x18] sm:$0xff]  ;;  %v245_v4 = vld [vmem:[%s3082_s2] sm:$0xff]  ;;  %v2219_v6 = vmov 2   ;;  %v258_v9 = vlaneseq }
  0x11   : > { %2184 = vset.pattern.permute.xlu1 %v2217_v1  ;;  %2183 = vset.pattern.permute.xlu0 %v3086_v2  ;;  %v246_v5 = vld [vmem:[%s3082_s2 + $0x8] sm:$0xff]  ;;  %s1987_s10 = sshll.u32 %s2264_s21, 1  ;;  %v249_v7 = vld [vmem:[%s3084_s4] sm:$0xff]  ;;  %s228_s30 = sand.u32 1, %s2207_s18  }
  0x12   : > { %316 = vperm.xlu1 %2184, %v247_v0   ;;  %280 = vperm.xlu0 %2183, %v247_v0   ;;  %p232_p7 = scmp.lt.s32.totalorder %s1987_s10, 3  ;;  %v250_v8 = vld [vmem:[%s3084_s4 + $0x8] sm:$0xff]  ;;  %v259_v12 = vshrl.u32 %v258_v9, 7  ;;  %s1986_s18 = sshll.u32 %s228_s30, 5 }
  0x13   : > { %1320 = vmatprep.mubr.bf16.mxu0 %v3086_v2  ;;  %1363 = vmatprep.mubr.bf16.mxu1 %v3086_v2  ;;  %s230_s6 = scalar_lea.vmem [#allocation3], %s1986_s18  ;;  %s2122_s7 = sshll.u32 (%p2276_p4), %s2264_s21, 4 }
  0x14   : > { %s3198_s10 = smov (!%p232_p7, %s1987_s10), 3  ;;  %v2322_v18 = vsub.s32 1, %v259_v12  ;;  %v2324_v20 = vsub.s32 0, %v259_v12 }
  0x15   : > { %s1988_s11 = sshll.u32 %s3198_s10, 3  ;;  %s1895_s10 = scalar_lea.vmem (%p2276_p4), %s3085_s5, %s2122_s7 }
  0x16   : > { %320 = vperm.xlu1 %2184, %v248_v3   ;;  %285 = vperm.xlu0 %2183, %v248_v3   ;;  %s2308_s20 = scalar_lea.vmem %s3080_s0, %s1988_s11  ;;  %s2313_s27 = scalar_lea.vmem %s3081_s1, %s1988_s11  ;;  %3117 = vst [vmem:[#allocation4_spill] sm:$0xff] %v2322_v18  ;;  %3118 = vst [vmem:[#allocation5_spill] sm:$0xff] %v2324_v20 }
  0x17   : > { %v251_v10 = vld [vmem:[%s2308_s20] ss:$8 sm:$0x3]  ;;  %v1995_v13 = vld [vmem:[%s2308_s20 + $0x1] ss:$8 sm:$0x3] }
  0x18   : > { %v252_v11 = vld [vmem:[%s2313_s27] ss:$8 sm:$0x3]  ;;  %v1996_v14 = vld [vmem:[%s2313_s27 + $0x1] ss:$8 sm:$0x3]  ;;  %vm253_vm0 = vcmp.ne.f32.partialorder %v251_v10, %v251_v10  ;;  %vm403_vm2 = vcmp.ne.f32.partialorder %v1995_v13, %v1995_v13 }
  0x19   : > { %v2001_v15 = vld [vmem:[%s2308_s20 + $0x2] ss:$8 sm:$0x3]  ;;  %vm255_vm1 = vcmp.ne.f32.partialorder %v252_v11, %v252_v11  ;;  %v2007_v17 = vld [vmem:[%s2308_s20 + $0x3] ss:$8 sm:$0x3]  ;;  %vm405_vm3 = vcmp.ne.f32.partialorder %v1996_v14, %v1996_v14 }
  0x1a   : > { %2185 = vset.pattern.permute.xlu1 %v3086_v2  ;;  %270 = vperm.xlu0 %2183, %v245_v4   ;;  %v2002_v16 = vld [vmem:[%s2313_s27 + $0x2] ss:$8 sm:$0x3]  ;;  %v254_v19 = vsel %vm253_vm0, 0.0, %v251_v10  ;;  %v256_v21 = vsel %vm255_vm1, 0.0, %v252_v11  ;;  %vm501_vm4 = vcmp.ne.f32.partialorder %v2001_v15, %v2001_v15  ;;  %vm599_vm6 = vcmp.ne.f32.partialorder %v2007_v17, %v2007_v17 }
  0x1b   : > { %275 = vperm.xlu1 %2185, %v246_v5   ;;  %vm503_vm5 = vcmp.ne.f32.partialorder %v2002_v16, %v2002_v16  ;;  %v404_v22 = vsel %vm403_vm2, 0.0, %v1995_v13  ;;  %v406_v23 = vsel %vm405_vm3, 0.0, %v1996_v14  ;;  %v2008_v24 = vld [vmem:[%s2313_s27 + $0x3] ss:$8 sm:$0x3]  ;;  %v2328_v25 = vrot.slane %v254_v19, %v2322_v18 }
  0x1c   : > { %v2013_v26 = vld [vmem:[%s2308_s20 + $0x4] ss:$8 sm:$0x3]  ;;  %v2332_v27 = vrot.slane %v256_v21, %v2322_v18  ;;  %v502_v28 = vsel %vm501_vm4, 0.0, %v2001_v15  ;;  %v504_v29 = vsel %vm503_vm5, 0.0, %v2002_v16  ;;  %v600_v30 = vsel %vm599_vm6, 0.0, %v2007_v17 }
  0x1d   : > { %v2014_v31 = vld [vmem:[%s2313_s27 + $0x4] ss:$8 sm:$0x3]  ;;  %v2336_v32 = vrot.slane %v404_v22, %v2322_v18  ;;  %v2339_v33 = vrot.slane %v406_v23, %v2322_v18  ;;  %v2342_v34 = vrot.slane %v254_v19, %v2324_v20  ;;  %vm601_vm7 = vcmp.ne.f32.partialorder %v2008_v24, %v2008_v24  ;;  %v2019_v35 = vld [vmem:[%s2308_s20 + $0x5] ss:$8 sm:$0x3] }
  0x1e   : > { %2186 = vset.pattern.permute.xlu0 %v2217_v1  ;;  %v2020_v36 = vld [vmem:[%s2313_s27 + $0x5] ss:$8 sm:$0x3]  ;;  %v2347_v37 = vrot.slane %v256_v21, %v2324_v20  ;;  %v2350_v38 = vrot.slane %v404_v22, %v2324_v20  ;;  %v2353_v39 = vrot.slane %v406_v23, %v2324_v20  ;;  %vm697_vm8 = vcmp.ne.f32.partialorder %v2013_v26, %v2013_v26  ;;  %v2025_v40 = vld [vmem:[%s2308_s20 + $0x6] ss:$8 sm:$0x3] }
  0x1f   : > { %2187 = vset.pattern.permute.xlu1 %v2217_v1  ;;  %308 = vperm.xlu0 %2186, %v245_v4   ;;  %v2026_v41 = vld [vmem:[%s2313_s27 + $0x6] ss:$8 sm:$0x3]  ;;  %v2358_v42 = vrot.slane %v502_v28, %v2324_v20  ;;  %v2361_v43 = vrot.slane %v502_v28, %v2322_v18  ;;  %v2364_v44 = vrot.slane %v504_v29, %v2324_v20  ;;  %v2031_v45 = vld [vmem:[%s2308_s20 + $0x7] ss:$8 sm:$0x3] }
  0x20   : > { %312 = vperm.xlu1 %2187, %v246_v5   ;;  %vm699_vm9 = vcmp.ne.f32.partialorder %v2014_v31, %v2014_v31  ;;  %v2032_v46 = vld [vmem:[%s2313_s27 + $0x7] ss:$8 sm:$0x3]  ;;  %v2369_v47 = vrot.slane %v504_v29, %v2322_v18  ;;  %v602_v48 = vsel %vm601_vm7, 0.0, %v2008_v24  ;;  %vm795_vm10 = vcmp.ne.f32.partialorder %v2019_v35, %v2019_v35 }
  0x21   : > { %vm797_vm11 = vcmp.ne.f32.partialorder %v2020_v36, %v2020_v36  ;;  %v2373_v49 = vrot.slane %v600_v30, %v2324_v20  ;;  %v698_v50 = vsel %vm697_vm8, 0.0, %v2013_v26  ;;  %vm893_vm12 = vcmp.ne.f32.partialorder %v2025_v40, %v2025_v40 }
  0x22   : > { %vm895_vm13 = vcmp.ne.f32.partialorder %v2026_v41, %v2026_v41  ;;  %v2376_v51 = vrot.slane %v600_v30, %v2322_v18  ;;  %v700_v52 = vsel %vm699_vm9, 0.0, %v2014_v31  ;;  %vm991_vm14 = vcmp.ne.f32.partialorder %v2031_v45, %v2031_v45 }
  0x23   : > { %2189 = vset.pattern.permute.xlu0 %v2219_v6  ;;  %vm993_vm15 = vcmp.ne.f32.partialorder %v2032_v46, %v2032_v46  ;;  %v2379_v53 = vrot.slane %v602_v48, %v2324_v20  ;;  %v2382_v54 = vrot.slane %v602_v48, %v2322_v18  ;;  %v796_v55 = vsel %vm795_vm10, 0.0, %v2019_v35 }
  0x24   : > { %2188 = vset.pattern.permute.xlu1 %v2219_v6  ;;  %352 = vperm.xlu0 %2189, %v248_v3   ;;  %v798_v56 = vsel %vm797_vm11, 0.0, %v2020_v36  ;;  %v2385_v57 = vrot.slane %v698_v50, %v2324_v20  ;;  %v2388_v58 = vrot.slane %v698_v50, %v2322_v18  ;;  %v894_v59 = vsel %vm893_vm12, 0.0, %v2025_v40 }
  0x25   : > { %348 = vperm.xlu1 %2188, %v247_v0   ;;  %v896_v60 = vsel %vm895_vm13, 0.0, %v2026_v41  ;;  %v2391_v61 = vrot.slane %v700_v52, %v2324_v20  ;;  %v2394_v62 = vrot.slane %v700_v52, %v2322_v18  ;;  %v992_v63 = vsel %vm991_vm14, 0.0, %v2031_v45 }
  0x26   : > { %3119 = vst [vmem:[#allocation6_spill] sm:$0xff] %v2385_v57  ;;  %3120 = vst [vmem:[#allocation7_spill] sm:$0xff] %v2388_v58  ;;  %v994_v0 = vsel %vm993_vm15, 0.0, %v2032_v46  ;;  %v2397_v1 = vrot.slane %v796_v55, %v2324_v20  ;;  %v2400_v3 = vrot.slane %v796_v55, %v2322_v18  ;;  %v2409_v6 = vrot.slane %v894_v59, %v2324_v20 }
  0x27   : > { %3121 = vst [vmem:[#allocation8_spill] sm:$0xff] %v2391_v61  ;;  %3122 = vst [vmem:[#allocation9_spill] sm:$0xff] %v2394_v62  ;;  %v2418_v9 = vrot.slane %v896_v60, %v2322_v18  ;;  %v2425_v12 = vrot.slane %v992_v63, %v2324_v20  ;;  %v2428_v13 = vrot.slane %v992_v63, %v2322_v18  ;;  %vm1284_vm0 = vcmask 261120  }
  0x28   : > { %2190 = vset.pattern.permute.xlu0 %v3086_v2  ;;  %3123 = vst [vmem:[#allocation10_spill] sm:$0xff] %v2397_v1  ;;  %3124 = vst [vmem:[#allocation11_spill] sm:$0xff] %v2400_v3  ;;  %v2431_v14 = vrot.slane %v994_v0, %v2324_v20  ;;  %v2434_v15 = vrot.slane %v994_v0, %v2322_v18  ;;  %vm2220_vm3 = vmmov 1  }
  0x29   : > { %340 = vperm.xlu1 %2188, %v245_v4   ;;  %1637 = vperm.xlu0 %2190, %v249_v7   ;;  %v2403_v4 = vrot.slane %v798_v56, %v2324_v20  ;;  %3127 = vst [vmem:[#allocation14_spill] sm:$0xff] %v2409_v6  ;;  %v2412_v7 = vrot.slane %v894_v59, %v2322_v18  ;;  %3130 = vst [vmem:[#allocation17_spill] sm:$0xff] %v2418_v9 }
  0x2a   : > { %3133 = vst [vmem:[#allocation20_spill] sm:$0xff] %v2425_v12  ;;  %3134 = vst [vmem:[#allocation21_spill] sm:$0xff] %v2428_v13 }
  0x2b   : > { %3125 = vst [vmem:[#allocation12_spill] sm:$0xff] %v2403_v4  ;;  %3128 = vst [vmem:[#allocation15_spill] sm:$0xff] %v2412_v7 }
  0x2c   : > { %3135 = vst [vmem:[#allocation22_spill] sm:$0xff] %v2431_v14  ;;  %3136 = vst [vmem:[#allocation23_spill] sm:$0xff] %v2434_v15 }
  0x2d   : > { %344 = vperm.xlu1 %2188, %v246_v5   ;;  %v2406_v5 = vrot.slane %v798_v56, %v2322_v18 }
  0x2f   : > { %3126 = vst [vmem:[#allocation13_spill] sm:$0xff] %v2406_v5 }
  0x31   : > { %2191 = vset.pattern.permute.xlu1 %v3086_v2 }
  0x32   : > { %1642 = vperm.xlu1 %2191, %v250_v8   ;;  %v2415_v8 = vrot.slane %v896_v60, %v2324_v20 }
  0x34   : > { %3129 = vst [vmem:[#allocation16_spill] sm:$0xff] %v2415_v8 }
  0x8d   : > { %v2420_v10 = vpop.permute.xlu1 %316  ;;  %v2422_v11 = vpop.permute.xlu0 %280 }
  0x8e   : > { %3131 = vst [vmem:[#allocation18_spill] sm:$0xff] %v2420_v10  ;;  %3132 = vst [vmem:[#allocation19_spill] sm:$0xff] %v2422_v11  ;;  %v293_v16 = vmul.f32 %v2422_v11, %v2328_v25  ;;  %v328_v17 = vmul.f32 %v2420_v10, %v2332_v27  ;;  %v423_v19 = vmul.f32 %v2336_v32, %v2422_v11 }
  0x8f   : > { %v442_v21 = vmul.f32 %v2339_v33, %v2420_v10  ;;  %v292_v22 = vmul.f32 %v2422_v11, %v2342_v34  ;;  %v327_v23 = vmul.f32 %v2420_v10, %v2347_v37  ;;  %v422_v24 = vmul.f32 %v2350_v38, %v2422_v11 }
  0x90   : > { %v441_v26 = vmul.f32 %v2353_v39, %v2420_v10  ;;  %v2452_v28 = vadd.f32 %v328_v17, %v293_v16  ;;  %v521_v30 = vmul.f32 %v2361_v43, %v2422_v11  ;;  %v540_v31 = vmul.f32 %v2369_v47, %v2420_v10 }
  0x91   : > { %v2454_v29 = vadd.f32 %v442_v21, %v423_v19  ;;  %v2460_v35 = vpop.permute.xlu1 %320  ;;  %v2462_v36 = vpop.permute.xlu0 %285  ;;  %v2464_v40 = vadd.f32 %v327_v23, %v292_v22  ;;  %v619_v45 = vmul.f32 %v2376_v51, %v2422_v11  ;;  %v638_v46 = vmul.f32 %v2382_v54, %v2420_v10 }
  0x92   : > { %3137 = vst [vmem:[#allocation24_spill] sm:$0xff] %v2460_v35  ;;  %3138 = vst [vmem:[#allocation25_spill] sm:$0xff] %v2462_v36  ;;  %v2466_v41 = vadd.f32 %v441_v26, %v422_v24  ;;  %v295_v48 = vmul.f32 %v2462_v36, %v2328_v25  ;;  %v330_v50 = vmul.f32 %v2460_v35, %v2332_v27 }
  0x93   : > { %v425_v52 = vmul.f32 %v2336_v32, %v2462_v36  ;;  %v444_v55 = vmul.f32 %v2339_v33, %v2460_v35  ;;  %v294_v56 = vmul.f32 %v2462_v36, %v2342_v34  ;;  %v329_v59 = vmul.f32 %v2460_v35, %v2347_v37 }
  0x94   : > { %v424_v60 = vmul.f32 %v2350_v38, %v2462_v36  ;;  %v443_v63 = vmul.f32 %v2353_v39, %v2460_v35  ;;  %v338_v0 = vadd.f32 %v330_v50, %v295_v48  ;;  %v523_v17 = vmul.f32 %v2361_v43, %v2462_v36 }
  0x95   : > { %v452_v16 = vadd.f32 %v444_v55, %v425_v52  ;;  %v542_v19 = vmul.f32 %v2369_v47, %v2460_v35  ;;  %v2492_v21 = vpop.permute.xlu0 %270  ;;  %v337_v22 = vadd.f32 %v329_v59, %v294_v56  ;;  %v2494_v24 = vadd.f32 %v540_v31, %v521_v30 }
  0x96   : > { %v451_v23 = vadd.f32 %v443_v63, %v424_v60  ;;  %v621_v26 = vmul.f32 %v2376_v51, %v2462_v36  ;;  %v2498_v2 = vpop.permute.xlu1 %275  ;;  %v289_v48 = vmul.f32 %v2492_v21, %v2328_v25  ;;  %v419_v50 = vmul.f32 %v2336_v32, %v2492_v21 }
  0x97   : > { %v288_v52 = vmul.f32 %v2492_v21, %v2342_v34  ;;  %v418_v55 = vmul.f32 %v2350_v38, %v2492_v21  ;;  %v291_v30 = vmul.f32 %v2498_v2, %v2328_v25  ;;  %v421_v31 = vmul.f32 %v2336_v32, %v2498_v2 }
  0x98   : > { %v290_v56 = vmul.f32 %v2498_v2, %v2342_v34  ;;  %v420_v59 = vmul.f32 %v2350_v38, %v2498_v2  ;;  %v550_v60 = vadd.f32 %v542_v19, %v523_v17  ;;  %v640_v63 = vmul.f32 %v2382_v54, %v2460_v35 }
  0x99   : > { %v646_v20 = vadd.f32 %v638_v46, %v619_v45  ;;  %v520_v18 = vmul.f32 %v2358_v42, %v2422_v11  ;;  %v522_v25 = vmul.f32 %v2358_v42, %v2462_v36  ;;  %v539_v32 = vmul.f32 %v2364_v44, %v2420_v10 }
  0x9a   : > { %v541_v34 = vmul.f32 %v2364_v44, %v2460_v35  ;;  %v618_v38 = vmul.f32 %v2373_v49, %v2422_v11  ;;  %v2528_v17 = vpop.permute.xlu0 %308  ;;  %v648_v19 = vadd.f32 %v640_v63, %v621_v26  ;;  %v620_v45 = vmul.f32 %v2373_v49, %v2462_v36 }
  0x9b   : > { %v637_v46 = vmul.f32 %v2379_v53, %v2420_v10  ;;  %v639_v14 = vmul.f32 %v2379_v53, %v2460_v35  ;;  %v2536_v12 = vpop.permute.xlu1 %312  ;;  %v324_v8 = vmul.f32 %v2528_v17, %v2332_v27  ;;  %v438_v6 = vmul.f32 %v2339_v33, %v2528_v17 }
  0x9c   : > { %v323_v26 = vmul.f32 %v2528_v17, %v2347_v37  ;;  %v437_v63 = vmul.f32 %v2353_v39, %v2528_v17  ;;  %v326_v15 = vmul.f32 %v2536_v12, %v2332_v27  ;;  %v440_v13 = vmul.f32 %v2339_v33, %v2536_v12 }
  0x9d   : > { %v325_v9 = vmul.f32 %v2536_v12, %v2347_v37  ;;  %v439_v7 = vmul.f32 %v2353_v39, %v2536_v12  ;;  %v332_v4 = vadd.f32 %v324_v8, %v289_v48  ;;  %v446_v1 = vadd.f32 %v438_v6, %v419_v50 }
  0x9e   : > { %v331_v61 = vadd.f32 %v323_v26, %v288_v52  ;;  %v445_v57 = vadd.f32 %v437_v63, %v418_v55  ;;  %v334_v5 = vadd.f32 %v326_v15, %v291_v30  ;;  %v448_v3 = vadd.f32 %v440_v13, %v421_v31 }
  0x9f   : > { %v333_v35 = vadd.f32 %v325_v9, %v290_v56  ;;  %v447_v62 = vadd.f32 %v439_v7, %v420_v59  ;;  %v2554_v10 = vpop.permute.xlu0 %352  ;;  %v547_v27 = vadd.f32 %v539_v32, %v520_v18  ;;  %v549_v36 = vadd.f32 %v541_v34, %v522_v25 }
  0xa0   : > { %v645_v58 = vadd.f32 %v637_v46, %v618_v38  ;;  %v647_v33 = vadd.f32 %v639_v14, %v620_v45  ;;  %v2556_v11 = vpop.permute.xlu1 %348  ;;  %v362_v37 = vadd.f32 %v2554_v10, %v338_v0  ;;  %v460_v39 = vadd.f32 %v452_v16, %v2554_v10 }
  0xa1   : > { %v361_v6 = vadd.f32 %v2554_v10, %v337_v22  ;;  %v459_v8 = vadd.f32 %v451_v23, %v2554_v10  ;;  %v360_v9 = vadd.f32 %v2556_v11, %v2452_v28  ;;  %v458_v7 = vadd.f32 %v2454_v29, %v2556_v11 }
  0xa2   : > { %v359_v18 = vadd.f32 %v2556_v11, %v2464_v40  ;;  %v457_v13 = vadd.f32 %v2466_v41, %v2556_v11  ;;  %v370_v14 = vmax.f32 %v362_v37, 0.0  ;;  %v468_v15 = vmax.f32 %v460_v39, 0.0 }
  0xa3   : > { %v369_v0 = vmax.f32 %v361_v6, 0.0  ;;  %v467_v16 = vmax.f32 %v459_v8, 0.0  ;;  %v368_v48 = vmax.f32 %v360_v9, 0.0  ;;  %v466_v22 = vmax.f32 %v458_v7, 0.0 }
  0xa4   : > { %v367_v50 = vmax.f32 %v359_v18, 0.0  ;;  %v465_v23 = vmax.f32 %v457_v13, 0.0  ;;  %v2570_v52 = vpop.permute.xlu1 %340  ;;  %v556_v28 = vadd.f32 %v2494_v24, %v2556_v11  ;;  %v558_v29 = vadd.f32 %v550_v60, %v2554_v10 }
  0xa5   : > { %v654_v40 = vadd.f32 %v646_v20, %v2556_v11  ;;  %v656_v55 = vadd.f32 %v648_v19, %v2554_v10  ;;  %v2140_v41 = vpack.c.bf16 %v370_v14, %v368_v48  ;;  %v2142_v30 = vpack.c.bf16 %v468_v15, %v466_v22 }
  0xa6   : > { %v2139_v31 = vpack.c.bf16 %v369_v0, %v367_v50  ;;  %v2141_v56 = vpack.c.bf16 %v467_v16, %v465_v23  ;;  %v356_v59 = vadd.f32 %v2570_v52, %v332_v4  ;;  %v454_v25 = vadd.f32 %v446_v1, %v2570_v52 }
  0xa7   : > { %v355_v32 = vadd.f32 %v2570_v52, %v331_v61  ;;  %v453_v34 = vadd.f32 %v445_v57, %v2570_v52  ;;  %1300 = vmatprep.subr.bf16.mxu0 %v2140_v41  ;;  %1343 = vmatprep.subr.bf16.mxu1 %v2142_v30  ;;  %v564_v24 = vmax.f32 %v556_v28, 0.0  ;;  %v566_v60 = vmax.f32 %v558_v29, 0.0 }
  0xa8   : > { %v662_v38 = vmax.f32 %v654_v40, 0.0  ;;  %v664_v20 = vmax.f32 %v656_v55, 0.0  ;;  %v2581_v45 = vpop.permute.xlu1 %344  ;;  %1301 = vmatpush1.bf16.msra.mxu0 %v2139_v31  ;;  %1344 = vmatpush1.bf16.msra.mxu1 %v2141_v56  ;;  %v364_v19 = vmax.f32 %v356_v59, 0.0  ;;  %v462_v46 = vmax.f32 %v454_v25, 0.0 }
  0xa9   : > { %v363_v26 = vmax.f32 %v355_v32, 0.0  ;;  %v461_v4 = vmax.f32 %v453_v34, 0.0  ;;  %v358_v1 = vadd.f32 %v2581_v45, %v334_v5  ;;  %v456_v61 = vadd.f32 %v448_v3, %v2581_v45 }
  0xaa   : > { %v357_v57 = vadd.f32 %v2581_v45, %v333_v35  ;;  %v455_v63 = vadd.f32 %v447_v62, %v2581_v45  ;;  %v2144_v37 = vpack.c.bf16 %v566_v60, %v564_v24  ;;  %v2146_v39 = vpack.c.bf16 %v664_v20, %v662_v38 }
  0xab   : > { %v555_v6 = vadd.f32 %v547_v27, %v2556_v11  ;;  %v557_v8 = vadd.f32 %v549_v36, %v2554_v10  ;;  %v366_v9 = vmax.f32 %v358_v1, 0.0  ;;  %v464_v7 = vmax.f32 %v456_v61, 0.0  ;;  %v2596_v27 = vld [vmem:[%s3083_s3] sm:$0xff]  }
  0xac   : > { %v365_v18 = vmax.f32 %v357_v57, 0.0  ;;  %v463_v13 = vmax.f32 %v455_v63, 0.0  ;;  %v653_v5 = vadd.f32 %v645_v58, %v2556_v11  ;;  %v655_v3 = vadd.f32 %v647_v33, %v2554_v10 }
  0xad   : > { %v563_v14 = vmax.f32 %v555_v6, 0.0  ;;  %v565_v15 = vmax.f32 %v557_v8, 0.0  ;;  %v2124_v0 = vpack.c.bf16 %v366_v9, %v364_v19  ;;  %v2126_v35 = vpack.c.bf16 %v464_v7, %v462_v46  ;;  %v3140_v6 = vld [vmem:[#allocation19_spill] sm:$0xff] }
  0xae   : > { %v2123_v16 = vpack.c.bf16 %v365_v18, %v363_v26  ;;  %v2125_v62 = vpack.c.bf16 %v463_v13, %v461_v4  ;;  %v661_v22 = vmax.f32 %v653_v5, 0.0  ;;  %v663_v50 = vmax.f32 %v655_v3, 0.0  ;;  %v3141_v8 = vld [vmem:[#allocation7_spill] sm:$0xff]  ;;  %v3142_v13 = vld [vmem:[#allocation25_spill] sm:$0xff] }
  0xaf   : > { %v2143_v48 = vpack.c.bf16 %v565_v15, %v563_v14  ;;  %v517_v36 = vmul.f32 %v2361_v43, %v2492_v21  ;;  %1302 = vmatprep.subr.bf16.mxu0 %v2124_v0  ;;  %1345 = vmatprep.subr.bf16.mxu1 %v2126_v35  ;;  %v519_v58 = vmul.f32 %v2361_v43, %v2498_v2  ;;  %v3139_v20 = vmov 0   ;;  %v3143_v14 = vld [vmem:[#allocation18_spill] sm:$0xff]  ;;  %v3144_v15 = vld [vmem:[#allocation9_spill] sm:$0xff]  ;;  %v3145_v35 = vld [vmem:[#allocation24_spill] sm:$0xff] }
  0xb0   : > { %v536_v33 = vmul.f32 %v2369_v47, %v2528_v17  ;;  %v538_v23 = vmul.f32 %v2369_v47, %v2536_v12  ;;  %1303 = vmatpush1.bf16.msra.mxu0 %v2123_v16  ;;  %1346 = vmatpush1.bf16.msra.mxu1 %v2125_v62  ;;  %v2145_v28 = vpack.c.bf16 %v663_v50, %v661_v22  ;;  %v3146_v16 = vld [vmem:[#allocation11_spill] sm:$0xff] }
  0xb1   : > { %v615_v29 = vmul.f32 %v2376_v51, %v2492_v21  ;;  %v617_v40 = vmul.f32 %v2376_v51, %v2498_v2  ;;  %1386 = vmatprep.subr.bf16.mxu0 %v2144_v37  ;;  %1429 = vmatprep.subr.bf16.mxu1 %v2146_v39  ;;  %v634_v41 = vmul.f32 %v2382_v54, %v2528_v17 }
  0xb2   : > { %v544_v55 = vadd.f32 %v536_v33, %v517_v36  ;;  %v546_v43 = vadd.f32 %v538_v23, %v519_v58  ;;  %v636_v47 = vmul.f32 %v2382_v54, %v2536_v12  ;;  %v516_v30 = vmul.f32 %v2358_v42, %v2492_v21  ;;  %v3147_v23 = vld [vmem:[#allocation13_spill] sm:$0xff] }
  0xb3   : > { %v518_v31 = vmul.f32 %v2358_v42, %v2498_v2  ;;  %v535_v56 = vmul.f32 %v2364_v44, %v2528_v17  ;;  %2070 = vmatmul.mubr.msk.bf16.vlgmr.msra.gmra.mxu0 %vm1284_vm0, %v2596_v27  ;;  %2071 = vmatmul.mubr.msk.bf16.vlgmr.msra.gmra.mxu1 %vm1284_vm0, %v2596_v27  ;;  %v642_v54 = vadd.f32 %v634_v41, %v615_v29  ;;  %v3148_v41 = vld [vmem:[#allocation6_spill] sm:$0xff] }
  0xb4   : > { %v552_v51 = vadd.f32 %v544_v55, %v2570_v52  ;;  %v554_v59 = vadd.f32 %v546_v43, %v2581_v45  ;;  %1387 = vmatpush1.bf16.msra.mxu0 %v2143_v48  ;;  %1430 = vmatpush1.bf16.msra.mxu1 %v2145_v28  ;;  %v644_v25 = vadd.f32 %v636_v47, %v617_v40 }
  0xb5   : > { %v537_v42 = vmul.f32 %v2364_v44, %v2536_v12  ;;  %v543_v32 = vadd.f32 %v535_v56, %v516_v30  ;;  %v650_v60 = vadd.f32 %v642_v54, %v2570_v52  ;;  %v614_v38 = vmul.f32 %v2373_v49, %v2492_v21  ;;  %1406 = vmatprep.mubr.bf16.mxu0 %v3139_v20 }
  0xb6   : > { %v560_v34 = vmax.f32 %v552_v51, 0.0  ;;  %v562_v24 = vmax.f32 %v554_v59, 0.0  ;;  %1449 = vmatprep.mubr.bf16.mxu1 %v3139_v20  ;;  %v652_v19 = vadd.f32 %v644_v25, %v2581_v45  ;;  %v616_v44 = vmul.f32 %v2373_v49, %v2498_v2  ;;  %v3149_v25 = vld [vmem:[#allocation8_spill] sm:$0xff] }
  0xb7   : > { %v545_v46 = vadd.f32 %v537_v42, %v518_v31  ;;  %v551_v26 = vadd.f32 %v543_v32, %v2570_v52  ;;  %v658_v1 = vmax.f32 %v650_v60, 0.0  ;;  %v633_v61 = vmul.f32 %v2379_v53, %v2528_v17 }
  0xb8   : > { %v2128_v4 = vpack.c.bf16 %v562_v24, %v560_v34  ;;  %v635_v57 = vmul.f32 %v2379_v53, %v2536_v12  ;;  %v660_v63 = vmax.f32 %v652_v19, 0.0  ;;  %v717_v9 = vmul.f32 %v3141_v8, %v3140_v6 }
  0xb9   : > { %v553_v37 = vadd.f32 %v545_v46, %v2581_v45  ;;  %v559_v39 = vmax.f32 %v551_v26, 0.0  ;;  %v641_v7 = vadd.f32 %v633_v61, %v614_v38  ;;  %v719_v49 = vmul.f32 %v3141_v8, %v3142_v13  ;;  %v3150_v38 = vld [vmem:[#allocation10_spill] sm:$0xff] }
  0xba   : > { %1388 = vmatprep.subr.bf16.mxu0 %v2128_v4  ;;  %v643_v18 = vadd.f32 %v635_v57, %v616_v44  ;;  %v736_v5 = vmul.f32 %v3144_v15, %v3143_v14  ;;  %v2130_v3 = vpack.c.bf16 %v660_v63, %v658_v1  ;;  %v738_v53 = vmul.f32 %v3144_v15, %v3145_v35  ;;  %v3151_v57 = vld [vmem:[#allocation12_spill] sm:$0xff] }
  0xbb   : > { %v561_v0 = vmax.f32 %v553_v37, 0.0  ;;  %v815_v62 = vmul.f32 %v3146_v16, %v3140_v6  ;;  %v649_v48 = vadd.f32 %v641_v7, %v2570_v52  ;;  %v817_v36 = vmul.f32 %v3146_v16, %v3142_v13 }
  0xbc   : > { %v651_v22 = vadd.f32 %v643_v18, %v2581_v45  ;;  %v744_v50 = vadd.f32 %v736_v5, %v717_v9  ;;  %1431 = vmatprep.subr.bf16.mxu1 %v2130_v3  ;;  %v746_v33 = vadd.f32 %v738_v53, %v719_v49  ;;  %v834_v28 = vmul.f32 %v3147_v23, %v3143_v14 }
  0xbd   : > { %v2127_v58 = vpack.c.bf16 %v561_v0, %v559_v39  ;;  %v836_v29 = vmul.f32 %v3147_v23, %v3145_v35  ;;  %v657_v40 = vmax.f32 %v649_v48, 0.0  ;;  %v716_v47 = vmul.f32 %v3148_v41, %v3140_v6 }
  0xbe   : > { %v659_v55 = vmax.f32 %v651_v22, 0.0  ;;  %v752_v43 = vadd.f32 %v744_v50, %v2556_v11  ;;  %v754_v30 = vadd.f32 %v746_v33, %v2554_v10  ;;  %v842_v31 = vadd.f32 %v834_v28, %v815_v62 }
  0xbf   : > { %1389 = vmatpush1.bf16.msra.mxu0 %v2127_v58  ;;  %v844_v56 = vadd.f32 %v836_v29, %v817_v36  ;;  %v718_v51 = vmul.f32 %v3148_v41, %v3142_v13  ;;  %v735_v42 = vmul.f32 %v3149_v25, %v3143_v14  ;;  %v737_v32 = vmul.f32 %v3149_v25, %v3145_v35 }
  0xc0   : > { %v2129_v59 = vpack.c.bf16 %v659_v55, %v657_v40  ;;  %v760_v54 = vmax.f32 %v752_v43, 0.0  ;;  %v762_v34 = vmax.f32 %v754_v30, 0.0  ;;  %v850_v24 = vadd.f32 %v842_v31, %v2556_v11 }
  0xc1   : > { %v852_v60 = vadd.f32 %v844_v56, %v2554_v10  ;;  %v814_v19 = vmul.f32 %v3150_v38, %v3140_v6  ;;  %v743_v46 = vadd.f32 %v735_v42, %v716_v47  ;;  %v745_v26 = vadd.f32 %v737_v32, %v718_v51 }
  0xc2   : > { %1432 = vmatpush1.bf16.msra.mxu1 %v2129_v59  ;;  %2072 = vmatmul.mubr.msk.bf16.vlgmr.msra.gmra.mxu0 %vm1284_vm0, %v2596_v27  ;;  %v816_v44 = vmul.f32 %v3150_v38, %v3142_v13  ;;  %v2148_v4 = vpack.c.bf16 %v762_v34, %v760_v54  ;;  %v858_v1 = vmax.f32 %v850_v24, 0.0  ;;  %v833_v63 = vmul.f32 %v3151_v57, %v3143_v14 }
  0xc3   : > { %v860_v61 = vmax.f32 %v852_v60, 0.0  ;;  %1492 = vmatprep.mubr.bf16.mxu0 %v3139_v20  ;;  %v751_v37 = vadd.f32 %v743_v46, %v2556_v11  ;;  %v753_v39 = vadd.f32 %v745_v26, %v2554_v10  ;;  %v835_v9 = vmul.f32 %v3151_v57, %v3145_v35 }
  0xc4   : > { %v713_v7 = vmul.f32 %v3141_v8, %v2492_v21  ;;  %1472 = vmatprep.subr.bf16.mxu0 %v2148_v4  ;;  %v841_v49 = vadd.f32 %v833_v63, %v814_v19  ;;  %v715_v5 = vmul.f32 %v3141_v8, %v2498_v2  ;;  %v732_v62 = vmul.f32 %v3144_v15, %v2528_v17 }
  0xc5   : > { %v2150_v18 = vpack.c.bf16 %v860_v61, %v858_v1  ;;  %2073 = vmatmul.mubr.msk.bf16.vlgmr.msra.gmra.mxu1 %vm1284_vm0, %v2596_v27  ;;  %v759_v3 = vmax.f32 %v751_v37, 0.0  ;;  %v761_v0 = vmax.f32 %v753_v39, 0.0  ;;  %v843_v53 = vadd.f32 %v835_v9, %v816_v44  ;;  %v3152_v39 = vld [vmem:[#allocation15_spill] sm:$0xff] }
  0xc6   : > { %1535 = vmatprep.mubr.bf16.mxu1 %v3139_v20  ;;  %v849_v48 = vadd.f32 %v841_v49, %v2556_v11  ;;  %v734_v22 = vmul.f32 %v3144_v15, %v2536_v12  ;;  %v811_v50 = vmul.f32 %v3146_v16, %v2492_v21  ;;  %v813_v8 = vmul.f32 %v3146_v16, %v2498_v2 }
  0xc7   : > { %1515 = vmatprep.subr.bf16.mxu1 %v2150_v18  ;;  %v2147_v36 = vpack.c.bf16 %v761_v0, %v759_v3  ;;  %v851_v58 = vadd.f32 %v843_v53, %v2554_v10  ;;  %v740_v33 = vadd.f32 %v732_v62, %v713_v7  ;;  %v830_v28 = vmul.f32 %v3147_v23, %v2528_v17  ;;  %v3154_v62 = vld [vmem:[#allocation21_spill] sm:$0xff] }
  0xc8   : > { %v857_v29 = vmax.f32 %v849_v48, 0.0  ;;  %v742_v40 = vadd.f32 %v734_v22, %v715_v5  ;;  %v832_v55 = vmul.f32 %v3147_v23, %v2536_v12  ;;  %v712_v15 = vmul.f32 %v3148_v41, %v2492_v21 }
  0xc9   : > { %1473 = vmatpush1.bf16.msra.mxu0 %v2147_v36  ;;  %v859_v43 = vmax.f32 %v851_v58, 0.0  ;;  %v748_v47 = vadd.f32 %v740_v33, %v2570_v52  ;;  %v838_v16 = vadd.f32 %v830_v28, %v811_v50  ;;  %v714_v30 = vmul.f32 %v3148_v41, %v2498_v2  ;;  %v3155_v36 = vld [vmem:[#allocation23_spill] sm:$0xff] }
  0xca   : > { %v750_v31 = vadd.f32 %v742_v40, %v2581_v45  ;;  %v840_v56 = vadd.f32 %v832_v55, %v813_v8  ;;  %v731_v51 = vmul.f32 %v3149_v25, %v2528_v17  ;;  %v733_v23 = vmul.f32 %v3149_v25, %v2536_v12 }
  0xcb   : > { %v2149_v59 = vpack.c.bf16 %v859_v43, %v857_v29  ;;  %v756_v54 = vmax.f32 %v748_v47, 0.0  ;;  %v846_v42 = vadd.f32 %v838_v16, %v2570_v52  ;;  %v810_v32 = vmul.f32 %v3150_v38, %v2492_v21  ;;  %v3156_v43 = vld [vmem:[#allocation14_spill] sm:$0xff] }
  0xcc   : > { %v758_v34 = vmax.f32 %v750_v31, 0.0  ;;  %v848_v24 = vadd.f32 %v840_v56, %v2581_v45  ;;  %v739_v41 = vadd.f32 %v731_v51, %v712_v15  ;;  %v741_v60 = vadd.f32 %v733_v23, %v714_v30  ;;  %v3157_v51 = vld [vmem:[#allocation16_spill] sm:$0xff] }
  0xcd   : > { %1516 = vmatpush1.bf16.msra.mxu1 %v2149_v59  ;;  %v854_v19 = vmax.f32 %v846_v42, 0.0  ;;  %v812_v46 = vmul.f32 %v3150_v38, %v2498_v2  ;;  %v829_v25 = vmul.f32 %v3151_v57, %v2528_v17  ;;  %v831_v26 = vmul.f32 %v3151_v57, %v2536_v12  ;;  %v3153_v57 = vld [vmem:[#allocation17_spill] sm:$0xff] }
  0xce   : > { %v2132_v44 = vpack.c.bf16 %v758_v34, %v756_v54  ;;  %v856_v4 = vmax.f32 %v848_v24, 0.0  ;;  %v747_v1 = vadd.f32 %v739_v41, %v2570_v52  ;;  %v749_v61 = vadd.f32 %v741_v60, %v2581_v45 }
  0xcf   : > { %v837_v63 = vadd.f32 %v829_v25, %v810_v32  ;;  %v839_v37 = vadd.f32 %v831_v26, %v812_v46  ;;  %v913_v9 = vmul.f32 %v3152_v39, %v3140_v6  ;;  %v915_v38 = vmul.f32 %v3152_v39, %v3142_v13  ;;  %v3158_v32 = vld [vmem:[#allocation20_spill] sm:$0xff]  ;;  %v3159_v26 = vld [vmem:[#allocation22_spill] sm:$0xff] }
  0xd0   : > { %1474 = vmatprep.subr.bf16.mxu0 %v2132_v44  ;;  %v2134_v7 = vpack.c.bf16 %v856_v4, %v854_v19  ;;  %v755_v18 = vmax.f32 %v747_v1, 0.0  ;;  %v757_v49 = vmax.f32 %v749_v61, 0.0  ;;  %v932_v5 = vmul.f32 %v3153_v57, %v3143_v14 }
  0xd1   : > { %v845_v3 = vadd.f32 %v837_v63, %v2570_v52  ;;  %v847_v0 = vadd.f32 %v839_v37, %v2581_v45  ;;  %v934_v53 = vmul.f32 %v3153_v57, %v3145_v35  ;;  %v1011_v48 = vmul.f32 %v3154_v62, %v3140_v6 }
  0xd2   : > { %1517 = vmatprep.subr.bf16.mxu1 %v2134_v7  ;;  %v2131_v22 = vpack.c.bf16 %v757_v49, %v755_v18  ;;  %v940_v50 = vadd.f32 %v932_v5, %v913_v9  ;;  %v1013_v8 = vmul.f32 %v3154_v62, %v3142_v13  ;;  %v1030_v58 = vmul.f32 %v3155_v36, %v3143_v14 }
  0xd3   : > { %v853_v33 = vmax.f32 %v845_v3, 0.0  ;;  %v855_v28 = vmax.f32 %v847_v0, 0.0  ;;  %v942_v29 = vadd.f32 %v934_v53, %v915_v38  ;;  %v1032_v40 = vmul.f32 %v3155_v36, %v3145_v35 }
  0xd4   : > { %1475 = vmatpush1.bf16.msra.mxu0 %v2131_v22  ;;  %v948_v55 = vadd.f32 %v940_v50, %v2556_v11  ;;  %v1038_v15 = vadd.f32 %v1030_v58, %v1011_v48  ;;  %v912_v47 = vmul.f32 %v3156_v43, %v3140_v6  ;;  %v914_v16 = vmul.f32 %v3156_v43, %v3142_v13 }
  0xd5   : > { %v2133_v30 = vpack.c.bf16 %v855_v28, %v853_v33  ;;  %v950_v31 = vadd.f32 %v942_v29, %v2554_v10  ;;  %v1040_v56 = vadd.f32 %v1032_v40, %v1013_v8  ;;  %v931_v23 = vmul.f32 %v3157_v51, %v3143_v14 }
  0xd6   : > { %v956_v59 = vmax.f32 %v948_v55, 0.0  ;;  %v1046_v54 = vadd.f32 %v1038_v15, %v2556_v11  ;;  %v933_v42 = vmul.f32 %v3157_v51, %v3145_v35  ;;  %v1010_v34 = vmul.f32 %v3158_v32, %v3140_v6 }
  0xd7   : > { %1518 = vmatpush1.bf16.msra.mxu1 %v2133_v30  ;;  %v958_v24 = vmax.f32 %v950_v31, 0.0  ;;  %v1048_v41 = vadd.f32 %v1040_v56, %v2554_v10  ;;  %2074 = vmatmul.mubr.msk.bf16.vlgmr.msra.gmra.mxu0 %vm1284_vm0, %v2596_v27  ;;  %v939_v60 = vadd.f32 %v931_v23, %v912_v47  ;;  %v1012_v19 = vmul.f32 %v3158_v32, %v3142_v13 }
  0xd8   : > { %v1054_v46 = vmax.f32 %v1046_v54, 0.0  ;;  %v941_v25 = vadd.f32 %v933_v42, %v914_v16  ;;  %v1029_v44 = vmul.f32 %v3159_v26, %v3143_v14  ;;  %v1031_v4 = vmul.f32 %v3159_v26, %v3145_v35  ;;  %1578 = vmatprep.mubr.bf16.mxu0 %v3139_v20 }
  0xd9   : > { %v2152_v6 = vpack.c.bf16 %v958_v24, %v956_v59  ;;  %v1056_v1 = vmax.f32 %v1048_v41, 0.0  ;;  %v947_v61 = vadd.f32 %v939_v60, %v2556_v11  ;;  %v909_v63 = vmul.f32 %v3152_v39, %v2492_v21 }
  0xda   : > { %2075 = vmatmul.mubr.msk.bf16.vlgmr.msra.gmra.mxu1 %vm1284_vm0, %v2596_v27  ;;  %v949_v13 = vadd.f32 %v941_v25, %v2554_v10  ;;  %v1037_v37 = vadd.f32 %v1029_v44, %v1010_v34  ;;  %v1039_v9 = vadd.f32 %v1031_v4, %v1012_v19  ;;  %v911_v14 = vmul.f32 %v3152_v39, %v2498_v2 }
  0xdb   : > { %1558 = vmatprep.subr.bf16.mxu0 %v2152_v6  ;;  %v2154_v35 = vpack.c.bf16 %v1056_v1, %v1054_v46  ;;  %v955_v38 = vmax.f32 %v947_v61, 0.0  ;;  %v928_v7 = vmul.f32 %v3153_v57, %v2528_v17  ;;  %v930_v18 = vmul.f32 %v3153_v57, %v2536_v12  ;;  %1621 = vmatprep.mubr.bf16.mxu1 %v3139_v20 }
  0xdc   : > { %v957_v49 = vmax.f32 %v949_v13, 0.0  ;;  %v1045_v5 = vadd.f32 %v1037_v37, %v2556_v11  ;;  %v1047_v3 = vadd.f32 %v1039_v9, %v2554_v10  ;;  %v1007_v0 = vmul.f32 %v3154_v62, %v2492_v21  ;;  %v2078_v37 = vld [vmem:[%s2308_s20 + $0x1] ss:$8 sm:$0x3] }
  0xdd   : > { %1601 = vmatprep.subr.bf16.mxu1 %v2154_v35  ;;  %v936_v39 = vadd.f32 %v928_v7, %v909_v63  ;;  %v938_v53 = vadd.f32 %v930_v18, %v911_v14  ;;  %v1009_v48 = vmul.f32 %v3154_v62, %v2498_v2  ;;  %v1026_v22 = vmul.f32 %v3155_v36, %v2528_v17  ;;  %v1632_v63 = vld [vmem:[%s2308_s20] ss:$8 sm:$0x3]  ;;  %v2079_v14 = vld [vmem:[%s2308_s20 + $0x2] ss:$8 sm:$0x3] }
  0xde   : > { %v2151_v57 = vpack.c.bf16 %v957_v49, %v955_v38  ;;  %v1053_v50 = vmax.f32 %v1045_v5, 0.0  ;;  %v1055_v8 = vmax.f32 %v1047_v3, 0.0  ;;  %v1028_v11 = vmul.f32 %v3155_v36, %v2536_v12  ;;  %v2081_v18 = vld [vmem:[%s2308_s20 + $0x4] ss:$8 sm:$0x3] }
  0xdf   : > { %v944_v10 = vadd.f32 %v936_v39, %v2570_v52  ;;  %v946_v58 = vadd.f32 %v938_v53, %v2581_v45  ;;  %v1034_v33 = vadd.f32 %v1026_v22, %v1007_v0  ;;  %v908_v28 = vmul.f32 %v3156_v43, %v2492_v21  ;;  %v2082_v5 = vld [vmem:[%s2308_s20 + $0x5] ss:$8 sm:$0x3] }
  0xe0   : > { %1559 = vmatpush1.bf16.msra.mxu0 %v2151_v57  ;;  %v2153_v29 = vpack.c.bf16 %v1055_v8, %v1053_v50  ;;  %v1036_v62 = vadd.f32 %v1028_v11, %v1009_v48  ;;  %v910_v40 = vmul.f32 %v3156_v43, %v2498_v2  ;;  %v927_v55 = vmul.f32 %v3157_v51, %v2528_v17  ;;  %v3160_v3 = vld [vmem:[#allocation4_spill] sm:$0xff]  ;;  %v3161_v48 = vld [vmem:[#allocation5_spill] sm:$0xff] }
  0xe1   : > { %v952_v15 = vmax.f32 %v944_v10, 0.0  ;;  %v954_v47 = vmax.f32 %v946_v58, 0.0  ;;  %v1042_v36 = vadd.f32 %v1034_v33, %v2570_v52  ;;  %v929_v16 = vmul.f32 %v3157_v51, %v2536_v12  ;;  %v2083_v8 = vld [vmem:[%s2308_s20 + $0x6] ss:$8 sm:$0x3]  ;;  %v2848_v58 = vpop.permute.xlu0 %1637 }
  0xe2   : > { %1602 = vmatpush1.bf16.msra.mxu1 %v2153_v29  ;;  %v1044_v30 = vadd.f32 %v1036_v62, %v2581_v45  ;;  %v935_v31 = vadd.f32 %v927_v55, %v908_v28  ;;  %v1006_v56 = vmul.f32 %v3158_v32, %v2492_v21  ;;  %v1008_v43 = vmul.f32 %v3158_v32, %v2498_v2  ;;  %v2084_v10 = vld [vmem:[%s2308_s20 + $0x7] ss:$8 sm:$0x3] }
  0xe3   : > { %v2136_v23 = vpack.c.bf16 %v954_v47, %v952_v15  ;;  %v937_v59 = vadd.f32 %v929_v16, %v910_v40  ;;  %v1025_v54 = vmul.f32 %v3159_v26, %v2528_v17  ;;  %v1050_v42 = vmax.f32 %v1042_v36, 0.0  ;;  %v2858_v40 = vpop.permute.xlu1 %1642 }
  0xe4   : > { %v1052_v34 = vmax.f32 %v1044_v30, 0.0  ;;  %v943_v24 = vadd.f32 %v935_v31, %v2570_v52  ;;  %v1027_v51 = vmul.f32 %v3159_v26, %v2536_v12  ;;  %vm1633_vm1 = vcmp.ne.f32.partialorder %v1632_v63, %v1632_v63 }
  0xe5   : > { %1560 = vmatprep.subr.bf16.mxu0 %v2136_v23  ;;  %v945_v41 = vadd.f32 %v937_v59, %v2581_v45  ;;  %v1033_v60 = vadd.f32 %v1025_v54, %v1006_v56  ;;  %vm1673_vm2 = vcmp.ne.f32.partialorder %v2078_v37, %v2078_v37  ;;  %vm1634_vm4 = vmxor %vm1633_vm1, %vm2220_vm3  ;;  %vm1703_vm5 = vcmp.ne.f32.partialorder %v2079_v14, %v2079_v14 }
  0xe6   : > { %v2138_v21 = vpack.c.bf16 %v1052_v34, %v1050_v42  ;;  %v1035_v19 = vadd.f32 %v1027_v51, %v1008_v43  ;;  %v951_v46 = vmax.f32 %v943_v24, 0.0  ;;  %vm1674_vm6 = vmxor %vm1673_vm2, %vm2220_vm3  ;;  %v1653_v49 = vsel %vm1634_vm4, 1, %v3139_v20 }
  0xe7   : > { %v953_v25 = vmax.f32 %v945_v41, 0.0  ;;  %v1041_v2 = vadd.f32 %v1033_v60, %v2570_v52  ;;  %vm1704_vm7 = vmxor %vm1703_vm5, %vm2220_vm3  ;;  %v1661_v0 = vrot.slane %v1653_v49, %v3160_v3  ;;  %v1683_v39 = vsel %vm1674_vm6, 1, %v3139_v20 }
  0xe8   : > { %1603 = vmatprep.subr.bf16.mxu1 %v2138_v21  ;;  %v1043_v17 = vadd.f32 %v1035_v19, %v2581_v45  ;;  %vm1763_vm9 = vcmp.ne.f32.partialorder %v2081_v18, %v2081_v18  ;;  %v1657_v22 = vrot.slane %v1653_v49, %v3161_v48  ;;  %v1713_v57 = vsel %vm1704_vm7, 1, %v3139_v20 }
  0xe9   : > { %v2135_v32 = vpack.c.bf16 %v953_v25, %v951_v46  ;;  %v1049_v44 = vmax.f32 %v1041_v2, 0.0  ;;  %vm1793_vm10 = vcmp.ne.f32.partialorder %v2082_v5, %v2082_v5  ;;  %v1691_v11 = vrot.slane %v1683_v39, %v3160_v3  ;;  %vm1764_vm12 = vmxor %vm1763_vm9, %vm2220_vm3 }
  0xea   : > { %v1051_v4 = vmax.f32 %v1043_v17, 0.0  ;;  %v1687_v33 = vrot.slane %v1683_v39, %v3161_v48  ;;  %vm2852_vm13 = vcmp.eq.s32.totalorder %v1661_v0, 1  ;;  %v1717_v29 = vrot.slane %v1713_v57, %v3161_v48  ;;  %vm1794_vm14 = vmxor %vm1793_vm10, %vm2220_vm3 }
  0xeb   : > { %1561 = vmatpush1.bf16.msra.mxu0 %v2135_v32  ;;  %vm1823_vm15 = vcmp.ne.f32.partialorder %v2083_v8, %v2083_v8  ;;  %v1721_v47 = vrot.slane %v1713_v57, %v3160_v3  ;;  %vm1853_vm1 = vcmp.ne.f32.partialorder %v2084_v10, %v2084_v10  ;;  %vm2868_vm2 = vcmp.eq.s32.totalorder %v1691_v11, 1 }
  0xec   : > { %v2137_v12 = vpack.c.bf16 %v1051_v4, %v1049_v44  ;;  %v1773_v56 = vsel %vm1764_vm12, 1, %v3139_v20  ;;  %vm2877_vm4 = vcmp.eq.s32.totalorder %v1687_v33, 1  ;;  %v2882_v54 = vsel %vm1794_vm14, 1, %v3139_v20  ;;  %vm1824_vm5 = vmxor %vm1823_vm15, %vm2220_vm3 }
  0xed   : > { %vm2888_vm6 = vcmp.eq.s32.totalorder %v1717_v29, 1  ;;  %vm1854_vm7 = vmxor %vm1853_vm1, %vm2220_vm3  ;;  %v1777_v46 = vrot.slane %v1773_v56, %v3161_v48  ;;  %v1781_v25 = vrot.slane %v1773_v56, %v3160_v3  ;;  %v1807_v32 = vrot.slane %v2882_v54, %v3161_v48 }
  0xee   : > { %1604 = vmatpush1.bf16.msra.mxu1 %v2137_v12  ;;  %2076 = vmatmul.mubr.msk.bf16.vlgmr.msra.gmra.mxu0 %vm1284_vm0, %v2596_v27  ;;  %v2907_v44 = vsel %vm1824_vm5, 1, %v3139_v20  ;;  %v1811_v37 = vrot.slane %v2882_v54, %v3160_v3 }
  0xef   : > { %v1837_v18 = vrot.slane %v2907_v44, %v3161_v48  ;;  %vm2947_vm10 = vcmp.eq.s32.totalorder %v1777_v46, 1  ;;  %vm2968_vm12 = vcmp.eq.s32.totalorder %v1807_v32, 1 }
  0xf0   : > { %vm2983_vm14 = vcmp.eq.s32.totalorder %v1811_v37, 1 }
  0xf1   : > { %2077 = vmatmul.mubr.msk.bf16.vlgmr.msra.gmra.mxu1 %vm1284_vm0, %v2596_v27  ;;  %v2080_v27 = vld [vmem:[%s2308_s20 + $0x3] ss:$8 sm:$0x3]  ;;  %vm2860_vm0 = vcmp.eq.s32.totalorder %v1657_v22, 1 }
  0xf2   : > { %vm1733_vm8 = vcmp.ne.f32.partialorder %v2080_v27, %v2080_v27 }
  0xf3   : > { %vm1734_vm11 = vmxor %vm1733_vm8, %vm2220_vm3  ;;  %vm2895_vm8 = vcmp.eq.s32.totalorder %v1721_v47, 1 }
  0xf4   : > { %v1743_v15 = vsel %vm1734_vm11, 1, %v3139_v20  ;;  %vm2951_vm11 = vcmp.eq.s32.totalorder %v1781_v25, 1 }
  0xf5   : > { %v1747_v51 = vrot.slane %v1743_v15, %v3161_v48  ;;  %v1751_v21 = vrot.slane %v1743_v15, %v3160_v3 }
  0xf7   : > { %vm2914_vm3 = vcmp.eq.s32.totalorder %v1747_v51, 1  ;;  %vm2933_vm9 = vcmp.eq.s32.totalorder %v1751_v21, 1 }
 0x173   : > { %v1322_v26 = vpop.f32.mrf.mxu0  ;;  %v1365_v6 = vpop.f32.mrf.mxu1 }
 0x174   : > { %v1645_v30 = vadd.f32 %v2848_v58, %v1322_v26  ;;  %v1675_v31 = vadd.f32 %v2848_v58, %v1365_v6 }
 0x175   : > { %v1324_v52 = vpop.f32.mrf.mxu0  ;;  %v1367_v45 = vpop.f32.mrf.mxu1 }
 0x176   : > { %v1646_v23 = vadd.f32 %v2848_v58, %v1324_v52  ;;  %v1676_v59 = vadd.f32 %v2848_v58, %v1367_v45  ;;  %v1649_v2 = vmax.f32 %v1645_v30, 0.0  ;;  %v1679_v17 = vmax.f32 %v1675_v31, 0.0 }
 0x177   : > { %v1326_v1 = vpop.f32.mrf.mxu0  ;;  %v1369_v13 = vpop.f32.mrf.mxu1  ;;  %v2912_v52 = vsel %vm1854_vm7, 1, %v3139_v20 }
 0x178   : > { %v1647_v42 = vadd.f32 %v2858_v40, %v1326_v1  ;;  %v1677_v34 = vadd.f32 %v2858_v40, %v1369_v13  ;;  %v1650_v4 = vmax.f32 %v1646_v23, 0.0  ;;  %v1680_v12 = vmax.f32 %v1676_v59, 0.0 }
 0x179   : > { %v2818_v61 = vpop.f32.mrf.mxu0  ;;  %v2825_v35 = vpop.f32.mrf.mxu1  ;;  %v1664_v49 = vsel %vm2860_vm0, %v1649_v2, 0.0  ;;  %v1871_v59 = vrot.slane %v2912_v52, %v3160_v3 }
 0x17a   : > { %v1651_v6 = vmax.f32 %v1647_v42, 0.0  ;;  %v1681_v1 = vmax.f32 %v1677_v34, 0.0  ;;  %v1648_v14 = vadd.f32 %v2858_v40, %v2818_v61  ;;  %v1678_v20 = vadd.f32 %v2858_v40, %v2825_v35 }
 0x17b   : > { %v1867_v61 = vrot.slane %v2912_v52, %v3161_v48  ;;  %v1841_v35 = vrot.slane %v2907_v44, %v3160_v3  ;;  %v1665_v0 = vsel %vm2852_vm13, %v1650_v4, 0.0  ;;  %v1695_v39 = vsel %vm2868_vm2, %v1680_v12, 0.0 }
 0x17c   : > { %v1666_v48 = vsel %vm2860_vm0, %v1651_v6, 0.0  ;;  %v1696_v11 = vsel %vm2877_vm4, %v1681_v1, 0.0  ;;  %v1652_v15 = vmax.f32 %v1648_v14, 0.0  ;;  %v1699_v56 = vadd.f32 %v1695_v39, %v1665_v0 }
 0x17d   : > { %v1700_v43 = vadd.f32 %v1696_v11, %v1666_v48  ;;  %vm3007_vm15 = vcmp.eq.s32.totalorder %v1867_v61, 1  ;;  %vm3024_vm0 = vcmp.eq.s32.totalorder %v1841_v35, 1  ;;  %vm3031_vm1 = vcmp.eq.s32.totalorder %v1871_v59, 1 }
 0x17e   : > { %v1667_v25 = vsel %vm2852_vm13, %v1652_v15, 0.0  ;;  %vm2993_vm13 = vcmp.eq.s32.totalorder %v1837_v18, 1 }
 0x182   : > { %v2822_v9 = vpop.f32.mrf.mxu0 }
 0x183   : > { %v1705_v26 = vadd.f32 %v2848_v58, %v2822_v9 }
 0x184   : > { %v2829_v38 = vpop.f32.mrf.mxu0 }
 0x185   : > { %v2832_v7 = vpop.f32.mrf.mxu1  ;;  %v1706_v63 = vadd.f32 %v2848_v58, %v2829_v38  ;;  %v1694_v38 = vsel %vm2877_vm4, %v1679_v17, 0.0 }
 0x186   : > { %v1412_v53 = vpop.f32.mrf.mxu0  ;;  %v1735_v22 = vadd.f32 %v2848_v58, %v2832_v7  ;;  %v1682_v7 = vmax.f32 %v1678_v20, 0.0  ;;  %v1698_v54 = vadd.f32 %v1694_v38, %v1664_v49 }
 0x187   : > { %v2842_v50 = vpop.f32.mrf.mxu1  ;;  %v1707_v9 = vadd.f32 %v2858_v40, %v1412_v53  ;;  %v1709_v53 = vmax.f32 %v1705_v26, 0.0  ;;  %v1710_v10 = vmax.f32 %v1706_v63, 0.0 }
 0x188   : > { %v1414_v62 = vpop.f32.mrf.mxu0  ;;  %v1736_v47 = vadd.f32 %v2848_v58, %v2842_v50  ;;  %v1739_v42 = vmax.f32 %v1735_v22, 0.0  ;;  %v1697_v2 = vsel %vm2868_vm2, %v1682_v7, 0.0 }
 0x189   : > { %v2866_v36 = vpop.f32.mrf.mxu1  ;;  %v1708_v33 = vadd.f32 %v2858_v40, %v1414_v62  ;;  %v1711_v30 = vmax.f32 %v1707_v9, 0.0  ;;  %v1724_v62 = vsel %vm2888_vm6, %v1709_v53, 0.0  ;;  %v1725_v50 = vsel %vm2895_vm8, %v1710_v10, 0.0 }
 0x18a   : > { %v1737_v51 = vadd.f32 %v2858_v40, %v2866_v36  ;;  %v1740_v17 = vmax.f32 %v1736_v47, 0.0  ;;  %v1728_v6 = vadd.f32 %v1724_v62, %v1698_v54  ;;  %v1754_v16 = vsel %vm2914_vm3, %v1739_v42, 0.0 }
 0x18b   : > { %v2900_v19 = vpop.f32.mrf.mxu1  ;;  %v1726_v32 = vsel %vm2888_vm6, %v1711_v30, 0.0  ;;  %v1729_v1 = vadd.f32 %v1725_v50, %v1699_v56  ;;  %v1701_v20 = vadd.f32 %v1697_v2, %v1667_v25 }
 0x18c   : > { %v1738_v36 = vadd.f32 %v2858_v40, %v2900_v19  ;;  %v1755_v9 = vsel %vm2933_vm9, %v1740_v17, 0.0  ;;  %v1758_v22 = vadd.f32 %v1754_v16, %v1728_v6 }
 0x18d   : > { %v1759_v48 = vadd.f32 %v1755_v9, %v1729_v1 }
 0x18e   : > { %v1742_v0 = vmax.f32 %v1738_v36, 0.0 }
 0x197   : > { %v1494_v41 = vpop.f32.mrf.mxu0 }
 0x198   : > { %v1765_v23 = vadd.f32 %v2848_v58, %v1494_v41  ;;  %v1712_v41 = vmax.f32 %v1708_v33, 0.0 }
 0x199   : > { %v1496_v13 = vpop.f32.mrf.mxu0 }
 0x19a   : > { %v1537_v27 = vpop.f32.mrf.mxu1  ;;  %v1766_v55 = vadd.f32 %v2848_v58, %v1496_v13  ;;  %v1769_v26 = vmax.f32 %v1765_v23, 0.0  ;;  %v1741_v13 = vmax.f32 %v1737_v51, 0.0  ;;  %v1727_v37 = vsel %vm2895_vm8, %v1712_v41, 0.0 }
 0x19b   : > { %v1498_v29 = vpop.f32.mrf.mxu0  ;;  %v1795_v52 = vadd.f32 %v2848_v58, %v1537_v27  ;;  %v1730_v27 = vadd.f32 %v1726_v32, %v1700_v43  ;;  %v1731_v11 = vadd.f32 %v1727_v37, %v1701_v20  ;;  %v1757_v23 = vsel %vm2933_vm9, %v1742_v0, 0.0 }
 0x19c   : > { %v1539_v31 = vpop.f32.mrf.mxu1  ;;  %v1767_v21 = vadd.f32 %v2858_v40, %v1498_v29  ;;  %v1770_v28 = vmax.f32 %v1766_v55, 0.0  ;;  %v1784_v18 = vsel %vm2947_vm10, %v1769_v26, 0.0  ;;  %v1756_v33 = vsel %vm2914_vm3, %v1741_v13, 0.0 }
 0x19d   : > { %v1500_v46 = vpop.f32.mrf.mxu0  ;;  %v1796_v19 = vadd.f32 %v2848_v58, %v1539_v31  ;;  %v1799_v39 = vmax.f32 %v1795_v52, 0.0  ;;  %v1760_v47 = vadd.f32 %v1756_v33, %v1730_v27  ;;  %v1788_v30 = vadd.f32 %v1784_v18, %v1758_v22 }
 0x19e   : > { %v1541_v12 = vpop.f32.mrf.mxu1  ;;  %v1768_v24 = vadd.f32 %v2858_v40, %v1500_v46  ;;  %v1771_v14 = vmax.f32 %v1767_v21, 0.0  ;;  %v1785_v60 = vsel %vm2951_vm11, %v1770_v28, 0.0  ;;  %v1761_v43 = vadd.f32 %v1757_v23, %v1731_v11 }
 0x19f   : > { %v1797_v49 = vadd.f32 %v2858_v40, %v1541_v12  ;;  %v1800_v29 = vmax.f32 %v1796_v19, 0.0  ;;  %v1789_v61 = vadd.f32 %v1785_v60, %v1759_v48  ;;  %v1814_v55 = vsel %vm2968_vm12, %v1799_v39, 0.0 }
 0x1a0   : > { %v1543_v38 = vpop.f32.mrf.mxu1  ;;  %v1772_v10 = vmax.f32 %v1768_v24, 0.0  ;;  %v1786_v15 = vsel %vm2947_vm10, %v1771_v14, 0.0  ;;  %v1818_v41 = vadd.f32 %v1814_v55, %v1788_v30 }
 0x1a1   : > { %v1798_v7 = vadd.f32 %v2858_v40, %v1543_v38  ;;  %v1801_v31 = vmax.f32 %v1797_v49, 0.0  ;;  %v1790_v54 = vadd.f32 %v1786_v15, %v1760_v47  ;;  %v1815_v50 = vsel %vm2983_vm14, %v1800_v29, 0.0 }
 0x1a2   : > { %v1787_v62 = vsel %vm2951_vm11, %v1772_v10, 0.0  ;;  %v1819_v21 = vadd.f32 %v1815_v50, %v1789_v61 }
 0x1a3   : > { %v1802_v51 = vmax.f32 %v1798_v7, 0.0  ;;  %v1816_v8 = vsel %vm2968_vm12, %v1801_v31, 0.0  ;;  %v1791_v59 = vadd.f32 %v1787_v62, %v1761_v43 }
 0x1a4   : > { %v1820_v36 = vadd.f32 %v1816_v8, %v1790_v54 }
 0x1a5   : > { %v1817_v34 = vsel %vm2983_vm14, %v1802_v51, 0.0 }
 0x1a6   : > { %v1821_v9 = vadd.f32 %v1817_v34, %v1791_v59 }
 0x1ae   : > { %v1580_v56 = vpop.f32.mrf.mxu0 }
 0x1af   : > { %v1825_v45 = vadd.f32 %v2848_v58, %v1580_v56 }
 0x1b0   : > { %v1582_v5 = vpop.f32.mrf.mxu0 }
 0x1b1   : > { %v1829_v3 = vmax.f32 %v1825_v45, 0.0  ;;  %v1623_v44 = vpop.f32.mrf.mxu1  ;;  %v1826_v35 = vadd.f32 %v2848_v58, %v1582_v5 }
 0x1b2   : > { %v1855_v46 = vadd.f32 %v2848_v58, %v1623_v44  ;;  %v1584_v25 = vpop.f32.mrf.mxu0 }
 0x1b3   : > { %v1844_v2 = vsel %vm2993_vm13, %v1829_v3, 0.0  ;;  %v1830_v17 = vmax.f32 %v1826_v35, 0.0  ;;  %v1625_v32 = vpop.f32.mrf.mxu1  ;;  %v1827_v12 = vadd.f32 %v2858_v40, %v1584_v25 }
 0x1b4   : > { %v1848_v26 = vadd.f32 %v1844_v2, %v1818_v41  ;;  %v1859_v52 = vmax.f32 %v1855_v46, 0.0  ;;  %v1856_v28 = vadd.f32 %v2848_v58, %v1625_v32  ;;  %v1586_v6 = vpop.f32.mrf.mxu0 }
 0x1b5   : > { %v1845_v16 = vsel %vm3024_vm0, %v1830_v17, 0.0  ;;  %v1831_v1 = vmax.f32 %v1827_v12, 0.0  ;;  %v1627_v24 = vpop.f32.mrf.mxu1  ;;  %v1828_v13 = vadd.f32 %v2858_v40, %v1586_v6 }
 0x1b6   : > { %v1874_v37 = vsel %vm3007_vm15, %v1859_v52, 0.0  ;;  %v1849_v19 = vadd.f32 %v1845_v16, %v1819_v21  ;;  %v1860_v14 = vmax.f32 %v1856_v28, 0.0  ;;  %v1857_v20 = vadd.f32 %v2858_v40, %v1627_v24 }
 0x1b7   : > { %v1878_v58 = vadd.f32 %v1874_v37, %v1848_v26  ;;  %v1846_v4 = vsel %vm2993_vm13, %v1831_v1, 0.0  ;;  %v1832_v27 = vmax.f32 %v1828_v13, 0.0  ;;  %v1629_v49 = vpop.f32.mrf.mxu1 }
 0x1b8   : > { %v1875_v38 = vsel %vm3031_vm1, %v1860_v14, 0.0  ;;  %v1850_v0 = vadd.f32 %v1846_v4, %v1820_v36  ;;  %v1861_v18 = vmax.f32 %v1857_v20, 0.0  ;;  %v1858_v39 = vadd.f32 %v2858_v40, %v1629_v49 }
 0x1b9   : > { %1882 = vst [vmem:[%s230_s6] sm:$0xff] %v1878_v58  ;;  %v1879_v60 = vadd.f32 %v1875_v38, %v1849_v19  ;;  %v1847_v22 = vsel %vm3024_vm0, %v1832_v27, 0.0 }
 0x1ba   : > { %v1876_v48 = vsel %vm3007_vm15, %v1861_v18, 0.0  ;;  %v1851_v63 = vadd.f32 %v1847_v22, %v1821_v9  ;;  %v1862_v11 = vmax.f32 %v1858_v39, 0.0 }
 0x1bb   : > { %1883 = vst [vmem:[%s230_s6 + $0x8] sm:$0xff] %v1879_v60  ;;  %v1880_v10 = vadd.f32 %v1876_v48, %v1850_v0  ;;  %1892 = sbr.rel (!%p2276_p4) target bundleno = 456 (0x1c8), region = 44 }
 0x1bc   : > { %v1877_v33 = vsel %vm3031_vm1, %v1862_v11, 0.0 }
 0x1bd   : > { %1884 = vst [vmem:[%s230_s6 + $0x10] sm:$0xff] %v1880_v10  ;;  %v1881_v29 = vadd.f32 %v1877_v33, %v1851_v63 }
 0x1bf   : > { %1885 = vst [vmem:[%s230_s6 + $0x18] sm:$0xff] %v1881_v29 }
 0x1c0   : > { %v1908_v40 = vld [vmem:[%s230_s6] sm:$0xff] }
 0x1c1   : > { %1909 = vst [vmem:[%s1895_s10] sm:$0xff] %v1908_v40 }
 0x1c2   : > { %v1910_v15 = vld [vmem:[%s230_s6 + $0x8] sm:$0xff] }
 0x1c3   : > { %1911 = vst [vmem:[%s1895_s10 + $0x8] sm:$0xff] %v1910_v15 }
 0x1c4   : > { %v1912_v7 = vld [vmem:[%s230_s6 + $0x10] sm:$0xff] }
 0x1c5   : > { %1913 = vst [vmem:[%s1895_s10 + $0x20] sm:$0xff] %v1912_v7 }
 0x1c6   : > { %v1914_v53 = vld [vmem:[%s230_s6 + $0x18] sm:$0xff] }
 0x1c7   : > { %1915 = vst [vmem:[%s1895_s10 + $0x28] sm:$0xff] %v1914_v53 }
 0x1c8 PF: > { %p12_p8 = scmp.ge.s32.totalorder %s2266_s22, 4   ;;  %s3194_s18 = smov %s2211_s19 }
 0x1c9   : > { %s3195_s19 = smov %s2274_s25  ;;  %s3196_s20 = smov %s2266_s22 }
 0x1ca   :  { %14 = sbr.rel (!%p12_p8) target bundleno = 2 (0x2), region = 110 }

</bundles_post_ra>
